<compile_context>
chip_gen: v7x
topology: tpu7x:2x2x1
jax: 0.10.0
libtpu: 0.0.40
codegen_flags: <defaults>
</compile_context>

<pallas_src>
import jax
import jax.numpy as jnp
from jax.experimental import pallas as pl
from jax.experimental.pallas import tpu as pltpu


def _round_up(x, m):
    return ((x + m - 1) // m) * m


def decoder_rnn_kernel(tok_ref,      # SMEM (S,) int32 token ids (scalar prefetch)
                       h0_ref,       # (1, H)         initial hidden
                       emb_ref,      # (V, 1, HP)     lane-padded embedding table
                       w_ref,        # (HP, 6*GP+Vp)  packed [W_ih^T | W_hh^T | W_out^T]
                       b_ref,        # (1, 6*GP+Vp)   packed [b_ih | b_hh | b_out(-1e30 pad)]
                       logp_ref,     # out (S, V)     log-probabilities
                       hout_ref,     # out (1, H)     final hidden
                       logits_sc):   # scratch (S, Vp) per-step logits
    H = h0_ref.shape[1]
    HP = emb_ref.shape[2]
    S, V = logp_ref.shape
    Vp = logits_sc.shape[1]
    GP = (w_ref.shape[1] - Vp) // 6

    # --- Embedding gather + ReLU for all timesteps (prologue, off the serial chain).
    rows = [emb_ref[tok_ref[t]] for t in range(S)]                 # each (1, HP)
    embedded = jnp.maximum(jnp.concatenate(rows, axis=0), 0.0)     # (S, HP)

    # --- Hoisted input->gate projection for ALL timesteps: one fat MXU pass.
    gx = jnp.dot(embedded, w_ref[:, 0:3 * GP],
                 preferred_element_type=jnp.float32) + b_ref[:, 0:3 * GP]   # (S, 3GP)

    whh = w_ref[:, 3 * GP:6 * GP]      # (HP, 3GP)  rows >= H are zero
    bhh = b_ref[:, 3 * GP:6 * GP]      # (1, 3GP)
    wout = w_ref[:, 6 * GP:]           # (HP, Vp)   rows >= H are zero
    bout = b_ref[:, 6 * GP:]           # (1, Vp)    lanes >= V carry -1e30

    # Hidden carried lane-padded to HP; pad lanes cannot leak (zero rows in whh/wout).
    h = h0_ref[...]
    if HP > H:
        h = jnp.concatenate([h, jnp.zeros((1, HP - H), jnp.float32)], axis=1)  # (1, HP)

    # --- Serial GRU recurrence, fully unrolled (S small & static).
    # One fused hidden->gate matmul per step; gate slices are whole 128-lane segments.
    for t in range(S):
        gh = jnp.dot(h, whh, preferred_element_type=jnp.float32) + bhh        # (1, 3GP)
        gx_t = gx[t:t + 1, :]
        r = jax.nn.sigmoid(gx_t[:, 0:GP] + gh[:, 0:GP])
        z = jax.nn.sigmoid(gx_t[:, GP:2 * GP] + gh[:, GP:2 * GP])
        n = jnp.tanh(gx_t[:, 2 * GP:3 * GP] + r * gh[:, 2 * GP:3 * GP])
        h = (1.0 - z) * n + z * h
        # Output projection interleaved: not on the serial dependence chain, so its MXU
        # push overlaps the next step's gate math.
        logits_sc[pl.ds(t, 1), :] = (
            jnp.dot(h, wout, preferred_element_type=jnp.float32) + bout)      # (1, Vp)

    hout_ref[...] = h[:, 0:H]

    # --- Batched LogSoftmax over the lane-padded vocab. Pad lanes carry -1e30 so they
    # never win the max and exp-underflow cleanly to 0 in the sum.
    logits = logits_sc[...]                                        # (S, Vp)
    m = jnp.max(logits, axis=-1, keepdims=True)
    s = logits - m
    lse = jnp.log(jnp.sum(jnp.exp(s), axis=-1, keepdims=True))
    logp_ref[...] = (s - lse)[:, 0:V]


def prepare_decoder_params(params):
    """One-time (call-invariant) packing of DecoderRNN weights into the kernel layout."""
    V, H = params["emb"].shape
    HP = _round_up(H, 128)     # padded hidden width (lane / contraction dim)
    GP = _round_up(H, 128)     # per-gate 128-lane segment
    Vp = _round_up(V, 128)     # padded vocab width

    emb_pad = jnp.zeros((V, 1, HP), jnp.float32).at[:, 0, :H].set(
        params["emb"].astype(jnp.float32))

    w_all = jnp.zeros((HP, 6 * GP + Vp), jnp.float32)
    b_all = jnp.zeros((1, 6 * GP + Vp), jnp.float32)
    w_ih = params["w_ih"].astype(jnp.float32)    # (3H, H), gate order r|z|n
    w_hh = params["w_hh"].astype(jnp.float32)
    b_ih = params["b_ih"].astype(jnp.float32)
    b_hh = params["b_hh"].astype(jnp.float32)
    for g in range(3):
        w_all = w_all.at[:H, g * GP:g * GP + H].set(w_ih[g * H:(g + 1) * H, :].T)
        w_all = w_all.at[:H, 3 * GP + g * GP:3 * GP + g * GP + H].set(
            w_hh[g * H:(g + 1) * H, :].T)
        b_all = b_all.at[0, g * GP:g * GP + H].set(b_ih[g * H:(g + 1) * H])
        b_all = b_all.at[0, 3 * GP + g * GP:3 * GP + g * GP + H].set(
            b_hh[g * H:(g + 1) * H])
    w_all = w_all.at[:H, 6 * GP:6 * GP + V].set(params["w_out"].astype(jnp.float32).T)
    b_all = b_all.at[0, 6 * GP:6 * GP + V].set(params["b_out"].astype(jnp.float32))
    if Vp > V:
        # Log-softmax sentinel on pad lanes: exp(-1e30 - m) underflows cleanly to 0.
        b_all = b_all.at[0, 6 * GP + V:].set(-1e30)

    return {"emb_pad": emb_pad, "w_all": w_all, "b_all": b_all,
            "H": H, "V": V, "HP": HP, "GP": GP, "Vp": Vp}


def decoder_rnn_forward(tokens, hidden, prepped):
    """tokens: (1, S) int ids; hidden: (1, 1, H) f32 — matches DecoderRNN.forward.
    Returns (log_probs (S, V), hidden (1, 1, H))."""
    S = tokens.shape[1]
    H, V, Vp = prepped["H"], prepped["V"], prepped["Vp"]

    tok = tokens.reshape(S).astype(jnp.int32)
    h0 = hidden.reshape(1, H).astype(jnp.float32)

    vmem = pl.BlockSpec(memory_space=pltpu.MemorySpace.VMEM)
    grid_spec = pltpu.PrefetchScalarGridSpec(
        num_scalar_prefetch=1,                     # token ids -> SMEM
        grid=(1,),
        in_specs=[vmem, vmem, vmem, vmem],         # h0, emb_pad, w_all, b_all
        out_specs=(vmem, vmem),
        scratch_shapes=[pltpu.VMEM((S, Vp), jnp.float32)],
    )
    logp, h_out = pl.pallas_call(
        decoder_rnn_kernel,
        grid_spec=grid_spec,
        out_shape=(jax.ShapeDtypeStruct((S, V), jnp.float32),
                   jax.ShapeDtypeStruct((1, H), jnp.float32)),
        compiler_params=pltpu.CompilerParams(dimension_semantics=("arbitrary",)),
    )(tok, h0, prepped["emb_pad"], prepped["w_all"], prepped["b_all"])

    return logp, h_out.reshape(1, 1, H)


def decoder_rnn_reference(tokens, hidden, params):
    """Pure-JAX reference with identical semantics (for correctness check)."""
    S = tokens.shape[1]
    V, H = params["emb"].shape
    emb = jnp.maximum(params["emb"][tokens.reshape(S)], 0.0)
    h = hidden.reshape(1, H)
    w_ih, w_hh = params["w_ih"], params["w_hh"]
    b_ih, b_hh = params["b_ih"], params["b_hh"]
    outs = []
    for t in range(S):
        x = emb[t:t + 1]
        gx = x @ w_ih.T + b_ih
        gh = h @ w_hh.T + b_hh
        r = jax.nn.sigmoid(gx[:, 0:H] + gh[:, 0:H])
        z = jax.nn.sigmoid(gx[:, H:2 * H] + gh[:, H:2 * H])
        n = jnp.tanh(gx[:, 2 * H:] + r * gh[:, 2 * H:])
        h = (1.0 - z) * n + z * h
        outs.append(h)
    out = jnp.concatenate(outs, axis=0)                       # (S, H) == output[0]
    logits = out @ params["w_out"].T + params["b_out"]
    logp = jax.nn.log_softmax(logits, axis=-1)
    return logp, h.reshape(1, 1, H)


if __name__ == "__main__":
    OUTPUT_SIZE = 64   # vocab
    HIDDEN = 32
    SEQ = 8

    key = jax.random.PRNGKey(0)
    k_tok, k_h, k_e, k_wih, k_whh, k_bih, k_bhh, k_wo, k_bo = jax.random.split(key, 9)

    tokens = jax.random.randint(k_tok, (1, SEQ), 0, OUTPUT_SIZE, dtype=jnp.int32)
    hidden0 = jax.random.normal(k_h, (1, 1, HIDDEN), dtype=jnp.float32)

    bound = 1.0 / jnp.sqrt(HIDDEN)
    params = {
        "emb":   jax.random.normal(k_e, (OUTPUT_SIZE, HIDDEN), dtype=jnp.float32),
        "w_ih":  jax.random.uniform(k_wih, (3 * HIDDEN, HIDDEN), jnp.float32, -bound, bound),
        "w_hh":  jax.random.uniform(k_whh, (3 * HIDDEN, HIDDEN), jnp.float32, -bound, bound),
        "b_ih":  jax.random.uniform(k_bih, (3 * HIDDEN,), jnp.float32, -bound, bound),
        "b_hh":  jax.random.uniform(k_bhh, (3 * HIDDEN,), jnp.float32, -bound, bound),
        "w_out": jax.random.uniform(k_wo, (OUTPUT_SIZE, HIDDEN), jnp.float32, -bound, bound),
        "b_out": jax.random.uniform(k_bo, (OUTPUT_SIZE,), jnp.float32, -bound, bound),
    }

    prepped = prepare_decoder_params(params)     # one-time weight packing
    logp, h_out = decoder_rnn_forward(tokens, hidden0, prepped)
    jax.block_until_ready((logp, h_out))

    logp_ref, h_ref = decoder_rnn_reference(tokens, hidden0, params)
    assert logp.shape == (SEQ, OUTPUT_SIZE) and h_out.shape == (1, 1, HIDDEN)
    assert jnp.allclose(logp, logp_ref, atol=1e-4, rtol=1e-4)
    assert jnp.allclose(h_out, h_ref, atol=1e-4, rtol=1e-4)

    print("KERNEL_OK")
</pallas_src>

<mosaic_0001>
module attributes {stable_mosaic.version = 11 : i64} {
  func.func @decoder_rnn_kernel(%arg0: i32, %arg1: memref<8xi32, #tpu.memory_space<smem>>, %arg2: memref<1x32xf32, #tpu.memory_space<vmem>>, %arg3: memref<64x1x128xf32, #tpu.memory_space<vmem>>, %arg4: memref<128x896xf32, #tpu.memory_space<vmem>>, %arg5: memref<1x896xf32, #tpu.memory_space<vmem>>, %arg6: memref<8x64xf32, #tpu.memory_space<vmem>>, %arg7: memref<1x32xf32, #tpu.memory_space<vmem>>, %arg8: memref<8x128xf32, #tpu.memory_space<vmem>>) attributes {dimension_semantics = [#tpu.dimension_semantics<arbitrary>], iteration_bounds = array<i64: 1>, scalar_prefetch = 1 : i64, scratch_operands = 1 : i64, tpu.core_type = #tpu.core_type<tc>, window_params = [{pipeline_mode = #tpu.pipeline_mode<synchronous>, transform_indices = @transform_0, window_bounds = array<i64: 1, 32>}, {pipeline_mode = #tpu.pipeline_mode<synchronous>, transform_indices = @transform_1, window_bounds = array<i64: 64, 1, 128>}, {pipeline_mode = #tpu.pipeline_mode<synchronous>, transform_indices = @transform_2, window_bounds = array<i64: 128, 896>}, {pipeline_mode = #tpu.pipeline_mode<synchronous>, transform_indices = @transform_3, window_bounds = array<i64: 1, 896>}, {pipeline_mode = #tpu.pipeline_mode<synchronous>, transform_indices = @transform_4, window_bounds = array<i64: 8, 64>}, {pipeline_mode = #tpu.pipeline_mode<synchronous>, transform_indices = @transform_5, window_bounds = array<i64: 1, 32>}]} {
    %c0 = arith.constant 0 : index
    %0 = memref.load %arg1[%c0] : memref<8xi32, #tpu.memory_space<smem>>
    %1 = arith.index_cast %0 : i32 to index
    %c0_0 = arith.constant 0 : index
    %c0_1 = arith.constant 0 : index
    %2 = vector.load %arg3[%1, %c0_0, %c0_1] : memref<64x1x128xf32, #tpu.memory_space<vmem>>, vector<1x1x128xf32>
    %3 = vector.shape_cast %2 : vector<1x1x128xf32> to vector<1x128xf32>
    %c1 = arith.constant 1 : index
    %4 = memref.load %arg1[%c1] : memref<8xi32, #tpu.memory_space<smem>>
    %5 = arith.index_cast %4 : i32 to index
    %c0_2 = arith.constant 0 : index
    %c0_3 = arith.constant 0 : index
    %6 = vector.load %arg3[%5, %c0_2, %c0_3] : memref<64x1x128xf32, #tpu.memory_space<vmem>>, vector<1x1x128xf32>
    %7 = vector.shape_cast %6 : vector<1x1x128xf32> to vector<1x128xf32>
    %c2 = arith.constant 2 : index
    %8 = memref.load %arg1[%c2] : memref<8xi32, #tpu.memory_space<smem>>
    %9 = arith.index_cast %8 : i32 to index
    %c0_4 = arith.constant 0 : index
    %c0_5 = arith.constant 0 : index
    %10 = vector.load %arg3[%9, %c0_4, %c0_5] : memref<64x1x128xf32, #tpu.memory_space<vmem>>, vector<1x1x128xf32>
    %11 = vector.shape_cast %10 : vector<1x1x128xf32> to vector<1x128xf32>
    %c3 = arith.constant 3 : index
    %12 = memref.load %arg1[%c3] : memref<8xi32, #tpu.memory_space<smem>>
    %13 = arith.index_cast %12 : i32 to index
    %c0_6 = arith.constant 0 : index
    %c0_7 = arith.constant 0 : index
    %14 = vector.load %arg3[%13, %c0_6, %c0_7] : memref<64x1x128xf32, #tpu.memory_space<vmem>>, vector<1x1x128xf32>
    %15 = vector.shape_cast %14 : vector<1x1x128xf32> to vector<1x128xf32>
    %c4 = arith.constant 4 : index
    %16 = memref.load %arg1[%c4] : memref<8xi32, #tpu.memory_space<smem>>
    %17 = arith.index_cast %16 : i32 to index
    %c0_8 = arith.constant 0 : index
    %c0_9 = arith.constant 0 : index
    %18 = vector.load %arg3[%17, %c0_8, %c0_9] : memref<64x1x128xf32, #tpu.memory_space<vmem>>, vector<1x1x128xf32>
    %19 = vector.shape_cast %18 : vector<1x1x128xf32> to vector<1x128xf32>
    %c5 = arith.constant 5 : index
    %20 = memref.load %arg1[%c5] : memref<8xi32, #tpu.memory_space<smem>>
    %21 = arith.index_cast %20 : i32 to index
    %c0_10 = arith.constant 0 : index
    %c0_11 = arith.constant 0 : index
    %22 = vector.load %arg3[%21, %c0_10, %c0_11] : memref<64x1x128xf32, #tpu.memory_space<vmem>>, vector<1x1x128xf32>
    %23 = vector.shape_cast %22 : vector<1x1x128xf32> to vector<1x128xf32>
    %c6 = arith.constant 6 : index
    %24 = memref.load %arg1[%c6] : memref<8xi32, #tpu.memory_space<smem>>
    %25 = arith.index_cast %24 : i32 to index
    %c0_12 = arith.constant 0 : index
    %c0_13 = arith.constant 0 : index
    %26 = vector.load %arg3[%25, %c0_12, %c0_13] : memref<64x1x128xf32, #tpu.memory_space<vmem>>, vector<1x1x128xf32>
    %27 = vector.shape_cast %26 : vector<1x1x128xf32> to vector<1x128xf32>
    %c7 = arith.constant 7 : index
    %28 = memref.load %arg1[%c7] : memref<8xi32, #tpu.memory_space<smem>>
    %29 = arith.index_cast %28 : i32 to index
    %c0_14 = arith.constant 0 : index
    %c0_15 = arith.constant 0 : index
    %30 = vector.load %arg3[%29, %c0_14, %c0_15] : memref<64x1x128xf32, #tpu.memory_space<vmem>>, vector<1x1x128xf32>
    %31 = vector.shape_cast %30 : vector<1x1x128xf32> to vector<1x128xf32>
    %32 = tpu.concatenate %3, %7, %11, %15, %19, %23, %27, %31 in 0 : vector<1x128xf32>, vector<1x128xf32>, vector<1x128xf32>, vector<1x128xf32>, vector<1x128xf32>, vector<1x128xf32>, vector<1x128xf32>, vector<1x128xf32> -> vector<8x128xf32>
    %cst = arith.constant 0.000000e+00 : f32
    %33 = vector.broadcast %cst : f32 to vector<8x128xf32>
    %34 = arith.maximumf %32, %33 : vector<8x128xf32>
    %c0_16 = arith.constant 0 : index
    %c0_17 = arith.constant 0 : index
    %35 = vector.load %arg4[%c0_16, %c0_17] : memref<128x896xf32, #tpu.memory_space<vmem>>, vector<128x384xf32>
    %cst_18 = arith.constant dense<0.000000e+00> : vector<8x384xf32>
    %36 = tpu.matmul %34, %35, %cst_18 {dimension_numbers = #tpu.dot_dimension_numbers<[1], [0], [0], [1], [0, 0, 1, 1], [], []>} : vector<8x128xf32>, vector<128x384xf32>, vector<8x384xf32> -> vector<8x384xf32>
    %c0_19 = arith.constant 0 : index
    %c0_20 = arith.constant 0 : index
    %37 = vector.load %arg5[%c0_19, %c0_20] : memref<1x896xf32, #tpu.memory_space<vmem>>, vector<1x384xf32>
    %38 = vector.broadcast %37 : vector<1x384xf32> to vector<8x384xf32>
    %39 = arith.addf %36, %38 : vector<8x384xf32>
    %c0_21 = arith.constant 0 : index
    %c384 = arith.constant 384 : index
    %40 = vector.load %arg4[%c0_21, %c384] : memref<128x896xf32, #tpu.memory_space<vmem>>, vector<128x384xf32>
    %c0_22 = arith.constant 0 : index
    %c384_23 = arith.constant 384 : index
    %41 = vector.load %arg5[%c0_22, %c384_23] : memref<1x896xf32, #tpu.memory_space<vmem>>, vector<1x384xf32>
    %c0_24 = arith.constant 0 : index
    %c768 = arith.constant 768 : index
    %42 = vector.load %arg4[%c0_24, %c768] : memref<128x896xf32, #tpu.memory_space<vmem>>, vector<128x128xf32>
    %c0_25 = arith.constant 0 : index
    %c768_26 = arith.constant 768 : index
    %43 = vector.load %arg5[%c0_25, %c768_26] : memref<1x896xf32, #tpu.memory_space<vmem>>, vector<1x128xf32>
    %c0_27 = arith.constant 0 : index
    %c0_28 = arith.constant 0 : index
    %44 = vector.load %arg2[%c0_27, %c0_28] : memref<1x32xf32, #tpu.memory_space<vmem>>, vector<1x32xf32>
    %cst_29 = arith.constant 0.000000e+00 : f32
    %45 = vector.broadcast %cst_29 : f32 to vector<1x96xf32>
    %46 = tpu.concatenate %44, %45 in 1 : vector<1x32xf32>, vector<1x96xf32> -> vector<1x128xf32>
    %cst_30 = arith.constant dense<0.000000e+00> : vector<1x384xf32>
    %47 = tpu.matmul %46, %40, %cst_30 {dimension_numbers = #tpu.dot_dimension_numbers<[1], [0], [0], [1], [0, 0, 1, 1], [], []>} : vector<1x128xf32>, vector<128x384xf32>, vector<1x384xf32> -> vector<1x384xf32>
    %48 = arith.addf %47, %41 : vector<1x384xf32>
    %49 = vector.extract_strided_slice %39 {offsets = [0, 0], sizes = [1, 384], strides = [1, 1]} : vector<8x384xf32> to vector<1x384xf32>
    %50 = vector.extract_strided_slice %49 {offsets = [0, 0], sizes = [1, 128], strides = [1, 1]} : vector<1x384xf32> to vector<1x128xf32>
    %51 = vector.extract_strided_slice %48 {offsets = [0, 0], sizes = [1, 128], strides = [1, 1]} : vector<1x384xf32> to vector<1x128xf32>
    %52 = arith.addf %50, %51 : vector<1x128xf32>
    %53 = arith.negf %52 : vector<1x128xf32>
    %54 = math.exp %53 : vector<1x128xf32>
    %cst_31 = arith.constant 1.000000e+00 : f32
    %55 = vector.broadcast %cst_31 : f32 to vector<1x128xf32>
    %56 = arith.addf %55, %54 : vector<1x128xf32>
    %57 = arith.divf %55, %56 : vector<1x128xf32>
    %58 = vector.extract_strided_slice %49 {offsets = [0, 128], sizes = [1, 128], strides = [1, 1]} : vector<1x384xf32> to vector<1x128xf32>
    %59 = vector.extract_strided_slice %48 {offsets = [0, 128], sizes = [1, 128], strides = [1, 1]} : vector<1x384xf32> to vector<1x128xf32>
    %60 = arith.addf %58, %59 : vector<1x128xf32>
    %61 = arith.negf %60 : vector<1x128xf32>
    %62 = math.exp %61 : vector<1x128xf32>
    %cst_32 = arith.constant 1.000000e+00 : f32
    %63 = vector.broadcast %cst_32 : f32 to vector<1x128xf32>
    %64 = arith.addf %63, %62 : vector<1x128xf32>
    %65 = arith.divf %63, %64 : vector<1x128xf32>
    %66 = vector.extract_strided_slice %49 {offsets = [0, 256], sizes = [1, 128], strides = [1, 1]} : vector<1x384xf32> to vector<1x128xf32>
    %67 = vector.extract_strided_slice %48 {offsets = [0, 256], sizes = [1, 128], strides = [1, 1]} : vector<1x384xf32> to vector<1x128xf32>
    %68 = arith.mulf %57, %67 : vector<1x128xf32>
    %69 = arith.addf %66, %68 : vector<1x128xf32>
    %70 = math.tanh %69 : vector<1x128xf32>
    %cst_33 = arith.constant 1.000000e+00 : f32
    %71 = vector.broadcast %cst_33 : f32 to vector<1x128xf32>
    %72 = arith.subf %71, %65 : vector<1x128xf32>
    %73 = arith.mulf %72, %70 : vector<1x128xf32>
    %74 = arith.mulf %65, %46 : vector<1x128xf32>
    %75 = arith.addf %73, %74 : vector<1x128xf32>
    %cst_34 = arith.constant dense<0.000000e+00> : vector<1x128xf32>
    %76 = tpu.matmul %75, %42, %cst_34 {dimension_numbers = #tpu.dot_dimension_numbers<[1], [0], [0], [1], [0, 0, 1, 1], [], []>} : vector<1x128xf32>, vector<128x128xf32>, vector<1x128xf32> -> vector<1x128xf32>
    %77 = arith.addf %76, %43 : vector<1x128xf32>
    %c0_35 = arith.constant 0 : index
    %c0_36 = arith.constant 0 : index
    %78 = vector.load %arg8[%c0_35, %c0_36] : memref<8x128xf32, #tpu.memory_space<vmem>>, vector<1x128xf32>
    tpu.vector_store %arg8[%c0_35, %c0_36], %77 {strides = array<i32>} : memref<8x128xf32, #tpu.memory_space<vmem>>, vector<1x128xf32>,
    %cst_37 = arith.constant dense<0.000000e+00> : vector<1x384xf32>
    %79 = tpu.matmul %75, %40, %cst_37 {dimension_numbers = #tpu.dot_dimension_numbers<[1], [0], [0], [1], [0, 0, 1, 1], [], []>} : vector<1x128xf32>, vector<128x384xf32>, vector<1x384xf32> -> vector<1x384xf32>
    %80 = arith.addf %79, %41 : vector<1x384xf32>
    %81 = vector.extract_strided_slice %39 {offsets = [1, 0], sizes = [1, 384], strides = [1, 1]} : vector<8x384xf32> to vector<1x384xf32>
    %82 = vector.extract_strided_slice %81 {offsets = [0, 0], sizes = [1, 128], strides = [1, 1]} : vector<1x384xf32> to vector<1x128xf32>
    %83 = vector.extract_strided_slice %80 {offsets = [0, 0], sizes = [1, 128], strides = [1, 1]} : vector<1x384xf32> to vector<1x128xf32>
    %84 = arith.addf %82, %83 : vector<1x128xf32>
    %85 = arith.negf %84 : vector<1x128xf32>
    %86 = math.exp %85 : vector<1x128xf32>
    %cst_38 = arith.constant 1.000000e+00 : f32
    %87 = vector.broadcast %cst_38 : f32 to vector<1x128xf32>
    %88 = arith.addf %87, %86 : vector<1x128xf32>
    %89 = arith.divf %87, %88 : vector<1x128xf32>
    %90 = vector.extract_strided_slice %81 {offsets = [0, 128], sizes = [1, 128], strides = [1, 1]} : vector<1x384xf32> to vector<1x128xf32>
    %91 = vector.extract_strided_slice %80 {offsets = [0, 128], sizes = [1, 128], strides = [1, 1]} : vector<1x384xf32> to vector<1x128xf32>
    %92 = arith.addf %90, %91 : vector<1x128xf32>
    %93 = arith.negf %92 : vector<1x128xf32>
    %94 = math.exp %93 : vector<1x128xf32>
    %cst_39 = arith.constant 1.000000e+00 : f32
    %95 = vector.broadcast %cst_39 : f32 to vector<1x128xf32>
    %96 = arith.addf %95, %94 : vector<1x128xf32>
    %97 = arith.divf %95, %96 : vector<1x128xf32>
    %98 = vector.extract_strided_slice %81 {offsets = [0, 256], sizes = [1, 128], strides = [1, 1]} : vector<1x384xf32> to vector<1x128xf32>
    %99 = vector.extract_strided_slice %80 {offsets = [0, 256], sizes = [1, 128], strides = [1, 1]} : vector<1x384xf32> to vector<1x128xf32>
    %100 = arith.mulf %89, %99 : vector<1x128xf32>
    %101 = arith.addf %98, %100 : vector<1x128xf32>
    %102 = math.tanh %101 : vector<1x128xf32>
    %cst_40 = arith.constant 1.000000e+00 : f32
    %103 = vector.broadcast %cst_40 : f32 to vector<1x128xf32>
    %104 = arith.subf %103, %97 : vector<1x128xf32>
    %105 = arith.mulf %104, %102 : vector<1x128xf32>
    %106 = arith.mulf %97, %75 : vector<1x128xf32>
    %107 = arith.addf %105, %106 : vector<1x128xf32>
    %cst_41 = arith.constant dense<0.000000e+00> : vector<1x128xf32>
    %108 = tpu.matmul %107, %42, %cst_41 {dimension_numbers = #tpu.dot_dimension_numbers<[1], [0], [0], [1], [0, 0, 1, 1], [], []>} : vector<1x128xf32>, vector<128x128xf32>, vector<1x128xf32> -> vector<1x128xf32>
    %109 = arith.addf %108, %43 : vector<1x128xf32>
    %c1_42 = arith.constant 1 : index
    %c0_43 = arith.constant 0 : index
    %110 = vector.load %arg8[%c1_42, %c0_43] : memref<8x128xf32, #tpu.memory_space<vmem>>, vector<1x128xf32>
    tpu.vector_store %arg8[%c1_42, %c0_43], %109 {strides = array<i32>} : memref<8x128xf32, #tpu.memory_space<vmem>>, vector<1x128xf32>,
    %cst_44 = arith.constant dense<0.000000e+00> : vector<1x384xf32>
    %111 = tpu.matmul %107, %40, %cst_44 {dimension_numbers = #tpu.dot_dimension_numbers<[1], [0], [0], [1], [0, 0, 1, 1], [], []>} : vector<1x128xf32>, vector<128x384xf32>, vector<1x384xf32> -> vector<1x384xf32>
    %112 = arith.addf %111, %41 : vector<1x384xf32>
    %113 = vector.extract_strided_slice %39 {offsets = [2, 0], sizes = [1, 384], strides = [1, 1]} : vector<8x384xf32> to vector<1x384xf32>
    %114 = vector.extract_strided_slice %113 {offsets = [0, 0], sizes = [1, 128], strides = [1, 1]} : vector<1x384xf32> to vector<1x128xf32>
    %115 = vector.extract_strided_slice %112 {offsets = [0, 0], sizes = [1, 128], strides = [1, 1]} : vector<1x384xf32> to vector<1x128xf32>
    %116 = arith.addf %114, %115 : vector<1x128xf32>
    %117 = arith.negf %116 : vector<1x128xf32>
    %118 = math.exp %117 : vector<1x128xf32>
    %cst_45 = arith.constant 1.000000e+00 : f32
    %119 = vector.broadcast %cst_45 : f32 to vector<1x128xf32>
    %120 = arith.addf %119, %118 : vector<1x128xf32>
    %121 = arith.divf %119, %120 : vector<1x128xf32>
    %122 = vector.extract_strided_slice %113 {offsets = [0, 128], sizes = [1, 128], strides = [1, 1]} : vector<1x384xf32> to vector<1x128xf32>
    %123 = vector.extract_strided_slice %112 {offsets = [0, 128], sizes = [1, 128], strides = [1, 1]} : vector<1x384xf32> to vector<1x128xf32>
    %124 = arith.addf %122, %123 : vector<1x128xf32>
    %125 = arith.negf %124 : vector<1x128xf32>
    %126 = math.exp %125 : vector<1x128xf32>
    %cst_46 = arith.constant 1.000000e+00 : f32
    %127 = vector.broadcast %cst_46 : f32 to vector<1x128xf32>
    %128 = arith.addf %127, %126 : vector<1x128xf32>
    %129 = arith.divf %127, %128 : vector<1x128xf32>
    %130 = vector.extract_strided_slice %113 {offsets = [0, 256], sizes = [1, 128], strides = [1, 1]} : vector<1x384xf32> to vector<1x128xf32>
    %131 = vector.extract_strided_slice %112 {offsets = [0, 256], sizes = [1, 128], strides = [1, 1]} : vector<1x384xf32> to vector<1x128xf32>
    %132 = arith.mulf %121, %131 : vector<1x128xf32>
    %133 = arith.addf %130, %132 : vector<1x128xf32>
    %134 = math.tanh %133 : vector<1x128xf32>
    %cst_47 = arith.constant 1.000000e+00 : f32
    %135 = vector.broadcast %cst_47 : f32 to vector<1x128xf32>
    %136 = arith.subf %135, %129 : vector<1x128xf32>
    %137 = arith.mulf %136, %134 : vector<1x128xf32>
    %138 = arith.mulf %129, %107 : vector<1x128xf32>
    %139 = arith.addf %137, %138 : vector<1x128xf32>
    %cst_48 = arith.constant dense<0.000000e+00> : vector<1x128xf32>
    %140 = tpu.matmul %139, %42, %cst_48 {dimension_numbers = #tpu.dot_dimension_numbers<[1], [0], [0], [1], [0, 0, 1, 1], [], []>} : vector<1x128xf32>, vector<128x128xf32>, vector<1x128xf32> -> vector<1x128xf32>
    %141 = arith.addf %140, %43 : vector<1x128xf32>
    %c2_49 = arith.constant 2 : index
    %c0_50 = arith.constant 0 : index
    %142 = vector.load %arg8[%c2_49, %c0_50] : memref<8x128xf32, #tpu.memory_space<vmem>>, vector<1x128xf32>
    tpu.vector_store %arg8[%c2_49, %c0_50], %141 {strides = array<i32>} : memref<8x128xf32, #tpu.memory_space<vmem>>, vector<1x128xf32>,
    %cst_51 = arith.constant dense<0.000000e+00> : vector<1x384xf32>
    %143 = tpu.matmul %139, %40, %cst_51 {dimension_numbers = #tpu.dot_dimension_numbers<[1], [0], [0], [1], [0, 0, 1, 1], [], []>} : vector<1x128xf32>, vector<128x384xf32>, vector<1x384xf32> -> vector<1x384xf32>
    %144 = arith.addf %143, %41 : vector<1x384xf32>
    %145 = vector.extract_strided_slice %39 {offsets = [3, 0], sizes = [1, 384], strides = [1, 1]} : vector<8x384xf32> to vector<1x384xf32>
    %146 = vector.extract_strided_slice %145 {offsets = [0, 0], sizes = [1, 128], strides = [1, 1]} : vector<1x384xf32> to vector<1x128xf32>
    %147 = vector.extract_strided_slice %144 {offsets = [0, 0], sizes = [1, 128], strides = [1, 1]} : vector<1x384xf32> to vector<1x128xf32>
    %148 = arith.addf %146, %147 : vector<1x128xf32>
    %149 = arith.negf %148 : vector<1x128xf32>
    %150 = math.exp %149 : vector<1x128xf32>
    %cst_52 = arith.constant 1.000000e+00 : f32
    %151 = vector.broadcast %cst_52 : f32 to vector<1x128xf32>
    %152 = arith.addf %151, %150 : vector<1x128xf32>
    %153 = arith.divf %151, %152 : vector<1x128xf32>
    %154 = vector.extract_strided_slice %145 {offsets = [0, 128], sizes = [1, 128], strides = [1, 1]} : vector<1x384xf32> to vector<1x128xf32>
    %155 = vector.extract_strided_slice %144 {offsets = [0, 128], sizes = [1, 128], strides = [1, 1]} : vector<1x384xf32> to vector<1x128xf32>
    %156 = arith.addf %154, %155 : vector<1x128xf32>
    %157 = arith.negf %156 : vector<1x128xf32>
    %158 = math.exp %157 : vector<1x128xf32>
    %cst_53 = arith.constant 1.000000e+00 : f32
    %159 = vector.broadcast %cst_53 : f32 to vector<1x128xf32>
    %160 = arith.addf %159, %158 : vector<1x128xf32>
    %161 = arith.divf %159, %160 : vector<1x128xf32>
    %162 = vector.extract_strided_slice %145 {offsets = [0, 256], sizes = [1, 128], strides = [1, 1]} : vector<1x384xf32> to vector<1x128xf32>
    %163 = vector.extract_strided_slice %144 {offsets = [0, 256], sizes = [1, 128], strides = [1, 1]} : vector<1x384xf32> to vector<1x128xf32>
    %164 = arith.mulf %153, %163 : vector<1x128xf32>
    %165 = arith.addf %162, %164 : vector<1x128xf32>
    %166 = math.tanh %165 : vector<1x128xf32>
    %cst_54 = arith.constant 1.000000e+00 : f32
    %167 = vector.broadcast %cst_54 : f32 to vector<1x128xf32>
    %168 = arith.subf %167, %161 : vector<1x128xf32>
    %169 = arith.mulf %168, %166 : vector<1x128xf32>
    %170 = arith.mulf %161, %139 : vector<1x128xf32>
    %171 = arith.addf %169, %170 : vector<1x128xf32>
    %cst_55 = arith.constant dense<0.000000e+00> : vector<1x128xf32>
    %172 = tpu.matmul %171, %42, %cst_55 {dimension_numbers = #tpu.dot_dimension_numbers<[1], [0], [0], [1], [0, 0, 1, 1], [], []>} : vector<1x128xf32>, vector<128x128xf32>, vector<1x128xf32> -> vector<1x128xf32>
    %173 = arith.addf %172, %43 : vector<1x128xf32>
    %c3_56 = arith.constant 3 : index
    %c0_57 = arith.constant 0 : index
    %174 = vector.load %arg8[%c3_56, %c0_57] : memref<8x128xf32, #tpu.memory_space<vmem>>, vector<1x128xf32>
    tpu.vector_store %arg8[%c3_56, %c0_57], %173 {strides = array<i32>} : memref<8x128xf32, #tpu.memory_space<vmem>>, vector<1x128xf32>,
    %cst_58 = arith.constant dense<0.000000e+00> : vector<1x384xf32>
    %175 = tpu.matmul %171, %40, %cst_58 {dimension_numbers = #tpu.dot_dimension_numbers<[1], [0], [0], [1], [0, 0, 1, 1], [], []>} : vector<1x128xf32>, vector<128x384xf32>, vector<1x384xf32> -> vector<1x384xf32>
    %176 = arith.addf %175, %41 : vector<1x384xf32>
    %177 = vector.extract_strided_slice %39 {offsets = [4, 0], sizes = [1, 384], strides = [1, 1]} : vector<8x384xf32> to vector<1x384xf32>
    %178 = vector.extract_strided_slice %177 {offsets = [0, 0], sizes = [1, 128], strides = [1, 1]} : vector<1x384xf32> to vector<1x128xf32>
    %179 = vector.extract_strided_slice %176 {offsets = [0, 0], sizes = [1, 128], strides = [1, 1]} : vector<1x384xf32> to vector<1x128xf32>
    %180 = arith.addf %178, %179 : vector<1x128xf32>
    %181 = arith.negf %180 : vector<1x128xf32>
    %182 = math.exp %181 : vector<1x128xf32>
    %cst_59 = arith.constant 1.000000e+00 : f32
    %183 = vector.broadcast %cst_59 : f32 to vector<1x128xf32>
    %184 = arith.addf %183, %182 : vector<1x128xf32>
    %185 = arith.divf %183, %184 : vector<1x128xf32>
    %186 = vector.extract_strided_slice %177 {offsets = [0, 128], sizes = [1, 128], strides = [1, 1]} : vector<1x384xf32> to vector<1x128xf32>
    %187 = vector.extract_strided_slice %176 {offsets = [0, 128], sizes = [1, 128], strides = [1, 1]} : vector<1x384xf32> to vector<1x128xf32>
    %188 = arith.addf %186, %187 : vector<1x128xf32>
    %189 = arith.negf %188 : vector<1x128xf32>
    %190 = math.exp %189 : vector<1x128xf32>
    %cst_60 = arith.constant 1.000000e+00 : f32
    %191 = vector.broadcast %cst_60 : f32 to vector<1x128xf32>
    %192 = arith.addf %191, %190 : vector<1x128xf32>
    %193 = arith.divf %191, %192 : vector<1x128xf32>
    %194 = vector.extract_strided_slice %177 {offsets = [0, 256], sizes = [1, 128], strides = [1, 1]} : vector<1x384xf32> to vector<1x128xf32>
    %195 = vector.extract_strided_slice %176 {offsets = [0, 256], sizes = [1, 128], strides = [1, 1]} : vector<1x384xf32> to vector<1x128xf32>
    %196 = arith.mulf %185, %195 : vector<1x128xf32>
    %197 = arith.addf %194, %196 : vector<1x128xf32>
    %198 = math.tanh %197 : vector<1x128xf32>
    %cst_61 = arith.constant 1.000000e+00 : f32
    %199 = vector.broadcast %cst_61 : f32 to vector<1x128xf32>
    %200 = arith.subf %199, %193 : vector<1x128xf32>
    %201 = arith.mulf %200, %198 : vector<1x128xf32>
    %202 = arith.mulf %193, %171 : vector<1x128xf32>
    %203 = arith.addf %201, %202 : vector<1x128xf32>
    %cst_62 = arith.constant dense<0.000000e+00> : vector<1x128xf32>
    %204 = tpu.matmul %203, %42, %cst_62 {dimension_numbers = #tpu.dot_dimension_numbers<[1], [0], [0], [1], [0, 0, 1, 1], [], []>} : vector<1x128xf32>, vector<128x128xf32>, vector<1x128xf32> -> vector<1x128xf32>
    %205 = arith.addf %204, %43 : vector<1x128xf32>
    %c4_63 = arith.constant 4 : index
    %c0_64 = arith.constant 0 : index
    %206 = vector.load %arg8[%c4_63, %c0_64] : memref<8x128xf32, #tpu.memory_space<vmem>>, vector<1x128xf32>
    tpu.vector_store %arg8[%c4_63, %c0_64], %205 {strides = array<i32>} : memref<8x128xf32, #tpu.memory_space<vmem>>, vector<1x128xf32>,
    %cst_65 = arith.constant dense<0.000000e+00> : vector<1x384xf32>
    %207 = tpu.matmul %203, %40, %cst_65 {dimension_numbers = #tpu.dot_dimension_numbers<[1], [0], [0], [1], [0, 0, 1, 1], [], []>} : vector<1x128xf32>, vector<128x384xf32>, vector<1x384xf32> -> vector<1x384xf32>
    %208 = arith.addf %207, %41 : vector<1x384xf32>
    %209 = vector.extract_strided_slice %39 {offsets = [5, 0], sizes = [1, 384], strides = [1, 1]} : vector<8x384xf32> to vector<1x384xf32>
    %210 = vector.extract_strided_slice %209 {offsets = [0, 0], sizes = [1, 128], strides = [1, 1]} : vector<1x384xf32> to vector<1x128xf32>
    %211 = vector.extract_strided_slice %208 {offsets = [0, 0], sizes = [1, 128], strides = [1, 1]} : vector<1x384xf32> to vector<1x128xf32>
    %212 = arith.addf %210, %211 : vector<1x128xf32>
    %213 = arith.negf %212 : vector<1x128xf32>
    %214 = math.exp %213 : vector<1x128xf32>
    %cst_66 = arith.constant 1.000000e+00 : f32
    %215 = vector.broadcast %cst_66 : f32 to vector<1x128xf32>
    %216 = arith.addf %215, %214 : vector<1x128xf32>
    %217 = arith.divf %215, %216 : vector<1x128xf32>
    %218 = vector.extract_strided_slice %209 {offsets = [0, 128], sizes = [1, 128], strides = [1, 1]} : vector<1x384xf32> to vector<1x128xf32>
    %219 = vector.extract_strided_slice %208 {offsets = [0, 128], sizes = [1, 128], strides = [1, 1]} : vector<1x384xf32> to vector<1x128xf32>
    %220 = arith.addf %218, %219 : vector<1x128xf32>
    %221 = arith.negf %220 : vector<1x128xf32>
    %222 = math.exp %221 : vector<1x128xf32>
    %cst_67 = arith.constant 1.000000e+00 : f32
    %223 = vector.broadcast %cst_67 : f32 to vector<1x128xf32>
    %224 = arith.addf %223, %222 : vector<1x128xf32>
    %225 = arith.divf %223, %224 : vector<1x128xf32>
    %226 = vector.extract_strided_slice %209 {offsets = [0, 256], sizes = [1, 128], strides = [1, 1]} : vector<1x384xf32> to vector<1x128xf32>
    %227 = vector.extract_strided_slice %208 {offsets = [0, 256], sizes = [1, 128], strides = [1, 1]} : vector<1x384xf32> to vector<1x128xf32>
    %228 = arith.mulf %217, %227 : vector<1x128xf32>
    %229 = arith.addf %226, %228 : vector<1x128xf32>
    %230 = math.tanh %229 : vector<1x128xf32>
    %cst_68 = arith.constant 1.000000e+00 : f32
    %231 = vector.broadcast %cst_68 : f32 to vector<1x128xf32>
    %232 = arith.subf %231, %225 : vector<1x128xf32>
    %233 = arith.mulf %232, %230 : vector<1x128xf32>
    %234 = arith.mulf %225, %203 : vector<1x128xf32>
    %235 = arith.addf %233, %234 : vector<1x128xf32>
    %cst_69 = arith.constant dense<0.000000e+00> : vector<1x128xf32>
    %236 = tpu.matmul %235, %42, %cst_69 {dimension_numbers = #tpu.dot_dimension_numbers<[1], [0], [0], [1], [0, 0, 1, 1], [], []>} : vector<1x128xf32>, vector<128x128xf32>, vector<1x128xf32> -> vector<1x128xf32>
    %237 = arith.addf %236, %43 : vector<1x128xf32>
    %c5_70 = arith.constant 5 : index
    %c0_71 = arith.constant 0 : index
    %238 = vector.load %arg8[%c5_70, %c0_71] : memref<8x128xf32, #tpu.memory_space<vmem>>, vector<1x128xf32>
    tpu.vector_store %arg8[%c5_70, %c0_71], %237 {strides = array<i32>} : memref<8x128xf32, #tpu.memory_space<vmem>>, vector<1x128xf32>,
    %cst_72 = arith.constant dense<0.000000e+00> : vector<1x384xf32>
    %239 = tpu.matmul %235, %40, %cst_72 {dimension_numbers = #tpu.dot_dimension_numbers<[1], [0], [0], [1], [0, 0, 1, 1], [], []>} : vector<1x128xf32>, vector<128x384xf32>, vector<1x384xf32> -> vector<1x384xf32>
    %240 = arith.addf %239, %41 : vector<1x384xf32>
    %241 = vector.extract_strided_slice %39 {offsets = [6, 0], sizes = [1, 384], strides = [1, 1]} : vector<8x384xf32> to vector<1x384xf32>
    %242 = vector.extract_strided_slice %241 {offsets = [0, 0], sizes = [1, 128], strides = [1, 1]} : vector<1x384xf32> to vector<1x128xf32>
    %243 = vector.extract_strided_slice %240 {offsets = [0, 0], sizes = [1, 128], strides = [1, 1]} : vector<1x384xf32> to vector<1x128xf32>
    %244 = arith.addf %242, %243 : vector<1x128xf32>
    %245 = arith.negf %244 : vector<1x128xf32>
    %246 = math.exp %245 : vector<1x128xf32>
    %cst_73 = arith.constant 1.000000e+00 : f32
    %247 = vector.broadcast %cst_73 : f32 to vector<1x128xf32>
    %248 = arith.addf %247, %246 : vector<1x128xf32>
    %249 = arith.divf %247, %248 : vector<1x128xf32>
    %250 = vector.extract_strided_slice %241 {offsets = [0, 128], sizes = [1, 128], strides = [1, 1]} : vector<1x384xf32> to vector<1x128xf32>
    %251 = vector.extract_strided_slice %240 {offsets = [0, 128], sizes = [1, 128], strides = [1, 1]} : vector<1x384xf32> to vector<1x128xf32>
    %252 = arith.addf %250, %251 : vector<1x128xf32>
    %253 = arith.negf %252 : vector<1x128xf32>
    %254 = math.exp %253 : vector<1x128xf32>
    %cst_74 = arith.constant 1.000000e+00 : f32
    %255 = vector.broadcast %cst_74 : f32 to vector<1x128xf32>
    %256 = arith.addf %255, %254 : vector<1x128xf32>
    %257 = arith.divf %255, %256 : vector<1x128xf32>
    %258 = vector.extract_strided_slice %241 {offsets = [0, 256], sizes = [1, 128], strides = [1, 1]} : vector<1x384xf32> to vector<1x128xf32>
    %259 = vector.extract_strided_slice %240 {offsets = [0, 256], sizes = [1, 128], strides = [1, 1]} : vector<1x384xf32> to vector<1x128xf32>
    %260 = arith.mulf %249, %259 : vector<1x128xf32>
    %261 = arith.addf %258, %260 : vector<1x128xf32>
    %262 = math.tanh %261 : vector<1x128xf32>
    %cst_75 = arith.constant 1.000000e+00 : f32
    %263 = vector.broadcast %cst_75 : f32 to vector<1x128xf32>
    %264 = arith.subf %263, %257 : vector<1x128xf32>
    %265 = arith.mulf %264, %262 : vector<1x128xf32>
    %266 = arith.mulf %257, %235 : vector<1x128xf32>
    %267 = arith.addf %265, %266 : vector<1x128xf32>
    %cst_76 = arith.constant dense<0.000000e+00> : vector<1x128xf32>
    %268 = tpu.matmul %267, %42, %cst_76 {dimension_numbers = #tpu.dot_dimension_numbers<[1], [0], [0], [1], [0, 0, 1, 1], [], []>} : vector<1x128xf32>, vector<128x128xf32>, vector<1x128xf32> -> vector<1x128xf32>
    %269 = arith.addf %268, %43 : vector<1x128xf32>
    %c6_77 = arith.constant 6 : index
    %c0_78 = arith.constant 0 : index
    %270 = vector.load %arg8[%c6_77, %c0_78] : memref<8x128xf32, #tpu.memory_space<vmem>>, vector<1x128xf32>
    tpu.vector_store %arg8[%c6_77, %c0_78], %269 {strides = array<i32>} : memref<8x128xf32, #tpu.memory_space<vmem>>, vector<1x128xf32>,
    %cst_79 = arith.constant dense<0.000000e+00> : vector<1x384xf32>
    %271 = tpu.matmul %267, %40, %cst_79 {dimension_numbers = #tpu.dot_dimension_numbers<[1], [0], [0], [1], [0, 0, 1, 1], [], []>} : vector<1x128xf32>, vector<128x384xf32>, vector<1x384xf32> -> vector<1x384xf32>
    %272 = arith.addf %271, %41 : vector<1x384xf32>
    %273 = vector.extract_strided_slice %39 {offsets = [7, 0], sizes = [1, 384], strides = [1, 1]} : vector<8x384xf32> to vector<1x384xf32>
    %274 = vector.extract_strided_slice %273 {offsets = [0, 0], sizes = [1, 128], strides = [1, 1]} : vector<1x384xf32> to vector<1x128xf32>
    %275 = vector.extract_strided_slice %272 {offsets = [0, 0], sizes = [1, 128], strides = [1, 1]} : vector<1x384xf32> to vector<1x128xf32>
    %276 = arith.addf %274, %275 : vector<1x128xf32>
    %277 = arith.negf %276 : vector<1x128xf32>
    %278 = math.exp %277 : vector<1x128xf32>
    %cst_80 = arith.constant 1.000000e+00 : f32
    %279 = vector.broadcast %cst_80 : f32 to vector<1x128xf32>
    %280 = arith.addf %279, %278 : vector<1x128xf32>
    %281 = arith.divf %279, %280 : vector<1x128xf32>
    %282 = vector.extract_strided_slice %273 {offsets = [0, 128], sizes = [1, 128], strides = [1, 1]} : vector<1x384xf32> to vector<1x128xf32>
    %283 = vector.extract_strided_slice %272 {offsets = [0, 128], sizes = [1, 128], strides = [1, 1]} : vector<1x384xf32> to vector<1x128xf32>
    %284 = arith.addf %282, %283 : vector<1x128xf32>
    %285 = arith.negf %284 : vector<1x128xf32>
    %286 = math.exp %285 : vector<1x128xf32>
    %cst_81 = arith.constant 1.000000e+00 : f32
    %287 = vector.broadcast %cst_81 : f32 to vector<1x128xf32>
    %288 = arith.addf %287, %286 : vector<1x128xf32>
    %289 = arith.divf %287, %288 : vector<1x128xf32>
    %290 = vector.extract_strided_slice %273 {offsets = [0, 256], sizes = [1, 128], strides = [1, 1]} : vector<1x384xf32> to vector<1x128xf32>
    %291 = vector.extract_strided_slice %272 {offsets = [0, 256], sizes = [1, 128], strides = [1, 1]} : vector<1x384xf32> to vector<1x128xf32>
    %292 = arith.mulf %281, %291 : vector<1x128xf32>
    %293 = arith.addf %290, %292 : vector<1x128xf32>
    %294 = math.tanh %293 : vector<1x128xf32>
    %cst_82 = arith.constant 1.000000e+00 : f32
    %295 = vector.broadcast %cst_82 : f32 to vector<1x128xf32>
    %296 = arith.subf %295, %289 : vector<1x128xf32>
    %297 = arith.mulf %296, %294 : vector<1x128xf32>
    %298 = arith.mulf %289, %267 : vector<1x128xf32>
    %299 = arith.addf %297, %298 : vector<1x128xf32>
    %cst_83 = arith.constant dense<0.000000e+00> : vector<1x128xf32>
    %300 = tpu.matmul %299, %42, %cst_83 {dimension_numbers = #tpu.dot_dimension_numbers<[1], [0], [0], [1], [0, 0, 1, 1], [], []>} : vector<1x128xf32>, vector<128x128xf32>, vector<1x128xf32> -> vector<1x128xf32>
    %301 = arith.addf %300, %43 : vector<1x128xf32>
    %c7_84 = arith.constant 7 : index
    %c0_85 = arith.constant 0 : index
    %302 = vector.load %arg8[%c7_84, %c0_85] : memref<8x128xf32, #tpu.memory_space<vmem>>, vector<1x128xf32>
    tpu.vector_store %arg8[%c7_84, %c0_85], %301 {strides = array<i32>} : memref<8x128xf32, #tpu.memory_space<vmem>>, vector<1x128xf32>,
    %303 = vector.extract_strided_slice %299 {offsets = [0, 0], sizes = [1, 32], strides = [1, 1]} : vector<1x128xf32> to vector<1x32xf32>
    %c0_86 = arith.constant 0 : index
    %c0_87 = arith.constant 0 : index
    %304 = vector.load %arg7[%c0_86, %c0_87] : memref<1x32xf32, #tpu.memory_space<vmem>>, vector<1x32xf32>
    tpu.vector_store %arg7[%c0_86, %c0_87], %303 {strides = array<i32>} : memref<1x32xf32, #tpu.memory_space<vmem>>, vector<1x32xf32>,
    %c0_88 = arith.constant 0 : index
    %c0_89 = arith.constant 0 : index
    %305 = vector.load %arg8[%c0_88, %c0_89] : memref<8x128xf32, #tpu.memory_space<vmem>>, vector<8x128xf32>
    %cst_90 = arith.constant dense<0xFF800000> : vector<8xf32>
    %306 = vector.multi_reduction <maximumf>, %305, %cst_90 [1] : vector<8x128xf32> to vector<8xf32>
    %307 = vector.shape_cast %306 : vector<8xf32> to vector<8x1xf32>
    %308 = vector.broadcast %307 : vector<8x1xf32> to vector<8x128xf32>
    %309 = arith.subf %305, %308 : vector<8x128xf32>
    %310 = math.exp %309 : vector<8x128xf32>
    %cst_91 = arith.constant dense<0.000000e+00> : vector<8xf32>
    %311 = vector.multi_reduction <add>, %310, %cst_91 [1] : vector<8x128xf32> to vector<8xf32>
    %312 = vector.shape_cast %311 : vector<8xf32> to vector<8x1xf32>
    %313 = math.log %312 : vector<8x1xf32>
    %314 = vector.broadcast %313 : vector<8x1xf32> to vector<8x128xf32>
    %315 = arith.subf %309, %314 : vector<8x128xf32>
    %316 = vector.extract_strided_slice %315 {offsets = [0, 0], sizes = [8, 64], strides = [1, 1]} : vector<8x128xf32> to vector<8x64xf32>
    %c0_92 = arith.constant 0 : index
    %c0_93 = arith.constant 0 : index
    %317 = vector.load %arg6[%c0_92, %c0_93] : memref<8x64xf32, #tpu.memory_space<vmem>>, vector<8x64xf32>
    tpu.vector_store %arg6[%c0_92, %c0_93], %316 {strides = array<i32>} : memref<8x64xf32, #tpu.memory_space<vmem>>, vector<8x64xf32>,
    return
  }
  func.func @transform_0(%arg0: i32, %arg1: memref<8xi32, #tpu.memory_space<smem>>) -> (i32, i32) {
    %c0_i32 = arith.constant 0 : i32
    %c0_i32_0 = arith.constant 0 : i32
    %c0_i32_1 = arith.constant 0 : i32
    return %c0_i32, %c0_i32_0 : i32, i32
  }
  func.func @transform_1(%arg0: i32, %arg1: memref<8xi32, #tpu.memory_space<smem>>) -> (i32, i32, i32) {
    %c0_i32 = arith.constant 0 : i32
    %c0_i32_0 = arith.constant 0 : i32
    %c0_i32_1 = arith.constant 0 : i32
    %c0_i32_2 = arith.constant 0 : i32
    return %c0_i32, %c0_i32_0, %c0_i32_1 : i32, i32, i32
  }
  func.func @transform_2(%arg0: i32, %arg1: memref<8xi32, #tpu.memory_space<smem>>) -> (i32, i32) {
    %c0_i32 = arith.constant 0 : i32
    %c0_i32_0 = arith.constant 0 : i32
    %c0_i32_1 = arith.constant 0 : i32
    return %c0_i32, %c0_i32_0 : i32, i32
  }
  func.func @transform_3(%arg0: i32, %arg1: memref<8xi32, #tpu.memory_space<smem>>) -> (i32, i32) {
    %c0_i32 = arith.constant 0 : i32
    %c0_i32_0 = arith.constant 0 : i32
    %c0_i32_1 = arith.constant 0 : i32
    return %c0_i32, %c0_i32_0 : i32, i32
  }
  func.func @transform_4(%arg0: i32, %arg1: memref<8xi32, #tpu.memory_space<smem>>) -> (i32, i32) {
    %c0_i32 = arith.constant 0 : i32
    %c0_i32_0 = arith.constant 0 : i32
    %c0_i32_1 = arith.constant 0 : i32
    return %c0_i32, %c0_i32_0 : i32, i32
  }
  func.func @transform_5(%arg0: i32, %arg1: memref<8xi32, #tpu.memory_space<smem>>) -> (i32, i32) {
    %c0_i32 = arith.constant 0 : i32
    %c0_i32_0 = arith.constant 0 : i32
    %c0_i32_1 = arith.constant 0 : i32
    return %c0_i32, %c0_i32_0 : i32, i32
  }
}

</mosaic_0001>

<bundles_post_ra>
// kernel: tpu_custom_call.1
= control target key start
LH: loop header
LB: loop body
LE: loop exit
PB: predicated region body
PF: predicated region fallthrough
CT: control target
= control target key end

     0   :  { %s5016_s0 = inlined_call_operand.hbm [shape: s32[8], index: 0, kind: input, shape index: {}]   ;;  %s5017_s1 = inlined_call_operand.vmem [shape: f32[1,32], index: 1, kind: input, shape index: {}]   ;;  %s5018_s2 = inlined_call_operand.hbm [shape: f32[64,1,128], index: 2, kind: input, shape index: {}]   ;;  %s5019_s3 = inlined_call_operand.hbm [shape: f32[128,896], index: 3, kind: input, shape index: {}]   ;;  %s5020_s4 = inlined_call_operand.vmem [shape: f32[1,896], index: 4, kind: input, shape index: {}]   ;;  %s5021_s5 = inlined_call_operand.hbm [shape: f32[8,64], index: 5, kind: output, shape index: {0}]   ;;  %s5022_s6 = inlined_call_operand.hbm [shape: f32[1,32], index: 6, kind: output, shape index: {1}]  }
   0x1   :  { %s4151_s23 = scalar_lea.hbm %s5016_s0, 16 }
   0x2   :  { %p4152_p0 = scmp.ne.s32.totalorder %s5016_s0, %s4151_s23  ;;  %p4155_p1 = scmp.lt.u32.totalorder %s4151_s23, %s5016_s0 }
   0x4   :  { %p4157_p2 = pnand %p4155_p1, %p4152_p0 }
   0x6   :  { %4160 = shalt.err (!%p4157_p2)  }
   0x7   :  { %s4259_s28 = smov [#allocation4]  }
   0x8   :  { %13 = dma.hbm_to_smem %s5016_s0, 16, %s4259_s28, [#allocation3] }
   0x9   :  { %4249 = dma.done.wait [#allocation3], 16 }
   0xa   :  { %4250 = vsyncadd [#allocation3], 4294967280 }
   0xb   :  { %15 = sfence }
   0xc   :  { %16 = vsyncpa [#allocation6], 0 }
   0xd   :  { %17 = vsyncpa [#allocation9], 0 }
   0xe   :  { %18 = vsyncpa [#allocation7], 0 }
   0xf   :  { %19 = vsyncpa [#allocation12], 0  ;;  %s4260_s7 = smov [#allocation5]   ;;  %s4161_s11 = scalar_lea.hbm %s5018_s2, 1024 }
  0x10   :  { %s27_s8 = sshll.u32 %s4260_s7, 4  ;;  %p4162_p3 = scmp.ne.s32.totalorder %s5018_s2, %s4161_s11  ;;  %s28_s8 = int_to_ptr.vmem [resolvable:$true] %s27_s8 }
  0x11   :  { %p4165_p4 = scmp.lt.u32.totalorder %s4161_s11, %s5018_s2 }
  0x13   :  { %p4167_p5 = pnand %p4165_p4, %p4162_p3 }
  0x15   :  { %4170 = shalt.err (!%p4167_p5)
}
  0x16   :  { %s4171_s15 = scalar_lea.vmem %s28_s8, 1024  ;;  %p4176_p7 = scmp.lt.s32.totalorder %s28_s8, %s28_s8 }
  0x17   :  { %p4172_p6 = scmp.ne.s32.totalorder %s28_s8, %s4171_s15  ;;  %p4177_p8 = scmp.lt.s32.totalorder %s4171_s15, %s4171_s15 }
  0x19   :  { %p4178_p9 = por %p4177_p8, %p4176_p7 }
  0x1b   :  { %p4179_p10 = pnand %p4178_p9, %p4172_p6 }
  0x1d   :  { %4182 = shalt.err (!%p4179_p10)
}
  0x1e   :  { %s4261_s16 = smov 16   ;;  %s4262_s17 = smov 1  }
  0x1f   :  { %33 = dma.hbm_to_vmem [thread:$0]  %s5018_s2, 1024, %s28_s8, [#allocation6], %s4261_s16, %s4261_s16, %s4262_s17  }
  0x20   :  { %s4263_s20 = smov [#allocation8]   ;;  %s4183_s24 = scalar_lea.hbm %s5019_s3, 14336 }
  0x21   :  { %s39_s21 = sshll.u32 %s4263_s20, 4  ;;  %p4184_p11 = scmp.ne.s32.totalorder %s5019_s3, %s4183_s24  ;;  %s40_s21 = int_to_ptr.vmem [resolvable:$true] %s39_s21 }
  0x22   :  { %p4187_p12 = scmp.lt.u32.totalorder %s4183_s24, %s5019_s3 }
  0x24   :  { %p4189_p13 = pnand %p4187_p12, %p4184_p11 }
  0x26   :  { %4192 = shalt.err (!%p4189_p13)
}
  0x27   :  { %s4193_s29 = scalar_lea.vmem %s40_s21, 14336  ;;  %p4198_p1 = scmp.lt.s32.totalorder %s40_s21, %s40_s21 }
  0x28   :  { %p4194_p0 = scmp.ne.s32.totalorder %s40_s21, %s4193_s29  ;;  %p4199_p2 = scmp.lt.s32.totalorder %s4193_s29, %s4193_s29 }
  0x2a   :  { %p4200_p3 = por %p4199_p2, %p4198_p1 }
  0x2c   :  { %p4201_p4 = pnand %p4200_p3, %p4194_p0 }
  0x2e   :  { %4204 = shalt.err (!%p4201_p4)
}
  0x2f   :  { %s4264_s2 = smov 896   ;;  %s4265_s30 = smov 56  }
  0x30   :  { %45 = dma.hbm_to_vmem [thread:$0]  %s5019_s3, 14336, %s40_s21, [#allocation9], %s4264_s2, %s4264_s2, %s4265_s30  }
  0x31   :  { %4251 = dma.done.wait [#allocation6], 1024  }
  0x32   :  { %4252 = vsyncadd [#allocation6], 4294966272 }
  0x33   :  { %4253 = dma.done.wait [#allocation9], 14336  }
  0x34   :  { %4254 = vsyncadd [#allocation9], 4294952960  ;;  %v4266_v0 = vmov 0.0|0.0   ;;  %v4267_v1 = vmov 0.0   ;;  %vm4268_vm0 = vmmov 0   ;;  %s4346_s9 = sld [smem:[#allocation4]] }
  0x35   :  { %3390 = vmatprep.subr.bf16.mxu1 %v4266_v0  ;;  %264 = vmatprep.mubr.f32.mxu0 %v4267_v1  ;;  %v136_v2 = vld [vmem:[#allocation8 + $0x8] sm:$0xff]  ;;  %v139_v3 = vld [vmem:[#allocation8 + $0x40] sm:$0xff]  ;;  %s4348_s3 = sld [smem:[#allocation4 + $0x1]]  ;;  %v138_v6 = vld [vmem:[#allocation8 + $0x38] sm:$0xff]  ;;  %s4350_s10 = sld [smem:[#allocation4 + $0x2]]  ;;  %vm120_vm1 = vcmask 1040384  }
  0x36   :  { %2795 = vmatprep.mubr.msk.f32.mxu1 %vm4268_vm0, %v4267_v1  ;;  %v135_v4 = vld [vmem:[#allocation8] sm:$0xff]  ;;  %v3358_v5 = vpack.c.bf16 %v139_v3, %v136_v2  ;;  %v142_v7 = vld [vmem:[#allocation8 + $0x78] sm:$0xff]  ;;  %v145_v8 = vld [vmem:[#allocation8 + $0xb0] sm:$0xff]  ;;  %s4352_s11 = sld [smem:[#allocation4 + $0x3]]  ;;  %s4354_s12 = sld [smem:[#allocation4 + $0x4]]  ;;  %vm122_vm2 = vcmask 1041408  }
  0x37   :  { %v3360_v9 = vpack.c.bf16 %v138_v6, %v135_v4  ;;  %v3362_v10 = vpack.c.bf16 %v145_v8, %v142_v7  ;;  %v141_v11 = vld [vmem:[#allocation8 + $0x70] sm:$0xff]  ;;  %v144_v12 = vld [vmem:[#allocation8 + $0xa8] sm:$0xff]  ;;  %v151_v14 = vld [vmem:[#allocation8 + $0x120] sm:$0xff]  ;;  %s4356_s13 = sld [smem:[#allocation4 + $0x5]]  ;;  %s4360_s15 = sld [smem:[#allocation4 + $0x6]]  ;;  %vm124_vm3 = vcmask 1042432  }
  0x38   :  { %v148_v13 = vld [vmem:[#allocation8 + $0xe8] sm:$0xff]  ;;  %3359 = vmatprep.subr.bf16.mxu0 %v3358_v5  ;;  %v3364_v15 = vpack.c.bf16 %v144_v12, %v141_v11  ;;  %v147_v17 = vld [vmem:[#allocation8 + $0xe0] sm:$0xff]  ;;  %v150_v18 = vld [vmem:[#allocation8 + $0x118] sm:$0xff]  ;;  %s4367_s18 = sld [smem:[#allocation4 + $0x7]]  ;;  %vm126_vm4 = vcmask 1043456   ;;  %vm128_vm5 = vcmask 1044480  }
  0x39   :  { %3361 = vmatpush1.bf16.msra.mxu0 %v3360_v9  ;;  %v3366_v16 = vpack.c.bf16 %v151_v14, %v148_v13  ;;  %v154_v19 = vld [vmem:[#allocation8 + $0x158] sm:$0xff]  ;;  %v157_v20 = vld [vmem:[#allocation8 + $0x190] sm:$0xff]  ;;  %v3368_v21 = vpack.c.bf16 %v150_v18, %v147_v17  ;;  %v156_v24 = vld [vmem:[#allocation8 + $0x188] sm:$0xff]  ;;  %vm130_vm6 = vcmask 1045504   ;;  %vm132_vm7 = vcmask 1046528  }
  0x3a   :  { %3363 = vmatprep.subr.bf16.mxu0 %v3362_v10  ;;  %v3370_v22 = vpack.c.bf16 %v157_v20, %v154_v19  ;;  %v153_v23 = vld [vmem:[#allocation8 + $0x150] sm:$0xff]  ;;  %v160_v25 = vld [vmem:[#allocation8 + $0x1c8] sm:$0xff]  ;;  %v163_v26 = vld [vmem:[#allocation8 + $0x200] sm:$0xff]  ;;  %s55_s14 = scalar_lea.vmem [#allocation5], %s4346_s9  ;;  %vm408_vm8 = vcmask 261120   ;;  %vm2389_vm9 = vcmask 261127  }
  0x3b   :  { %v137_v27 = vld [vmem:[#allocation8 + $0x10] sm:$0xff]  ;;  %v140_v28 = vld [vmem:[#allocation8 + $0x48] sm:$0xff]  ;;  %s58_s0 = scalar_lea.vmem [#allocation5], %s4348_s3  ;;  %v3372_v32 = vpack.c.bf16 %v156_v24, %v153_v23  ;;  %v159_v33 = vld [vmem:[#allocation8 + $0x1c0] sm:$0xff]  ;;  %s61_s16 = scalar_lea.vmem [#allocation5], %s4350_s10  ;;  %v3374_v36 = vpack.c.bf16 %v163_v26, %v160_v25 }
  0x3c   :  { %v3391_v29 = vpack.c.bf16 %v140_v28, %v137_v27  ;;  %v56_v30 = vld [vmem:[%s55_s14] sm:$0x1]  ;;  %v162_v37 = vld [vmem:[#allocation8 + $0x1f8] sm:$0xff]  ;;  %s64_s17 = scalar_lea.vmem [#allocation5], %s4352_s11  ;;  %v143_v42 = vld [vmem:[#allocation8 + $0x80] sm:$0xff]  ;;  %s67_s19 = scalar_lea.vmem [#allocation5], %s4354_s12 }
  0x3d   :  { %3365 = vmatpush1.bf16.msra.mxu0 %v3364_v15  ;;  %v2449_v31 = vld [vmem:[%s58_s0] ss:$0 sm:$0xff]  ;;  %v166_v38 = vld [vmem:[#allocation8 + $0x238] sm:$0xff]  ;;  %v3376_v45 = vpack.c.bf16 %v162_v37, %v159_v33  ;;  %v152_v49 = vld [vmem:[#allocation8 + $0x128] sm:$0xff]  ;;  %s70_s20 = scalar_lea.vmem [#allocation5], %s4356_s13  ;;  %s73_s21 = scalar_lea.vmem [#allocation5], %s4360_s15 }
  0x3e   :  { %3367 = vmatprep.subr.bf16.mxu0 %v3366_v16  ;;  %v2450_v34 = vld [vmem:[%s61_s16] ss:$0 sm:$0xff]  ;;  %v121_v35 = vsel %vm120_vm1, %v56_v30, %v2449_v31  ;;  %3392 = vmatpush3.bf16.msra.mxu1 %v3391_v29  ;;  %v146_v43 = vld [vmem:[#allocation8 + $0xb8] sm:$0xff]  ;;  %v168_v52 = vld [vmem:[#allocation8 + $0x268] sm:$0xff]  ;;  %s76_s22 = scalar_lea.vmem [#allocation5], %s4367_s18 }
  0x3f   :  { %v2451_v39 = vld [vmem:[%s64_s17] ss:$0 sm:$0xff]  ;;  %v123_v40 = vsel %vm122_vm2, %v121_v35, %v2450_v34  ;;  %3393 = vmatprep.subr.bf16.mxu1 %v4266_v0  ;;  %v3394_v44 = vpack.c.bf16 %v146_v43, %v143_v42  ;;  %v172_v53 = vld [vmem:[#allocation8 + $0x2a8] sm:$0xff]  ;;  %v175_v55 = vld [vmem:[#allocation8 + $0x2e0] sm:$0xff] }
  0x40   :  { %v169_v41 = vld [vmem:[#allocation8 + $0x270] sm:$0xff]  ;;  %v125_v47 = vsel %vm124_vm3, %v123_v40, %v2451_v39  ;;  %v155_v56 = vld [vmem:[#allocation8 + $0x160] sm:$0xff]  ;;  %v158_v57 = vld [vmem:[#allocation8 + $0x198] sm:$0xff]  ;;  %v3382_v62 = vpack.c.bf16 %v175_v55, %v172_v53 }
  0x41   :  { %3369 = vmatpush1.bf16.msra.mxu0 %v3368_v21  ;;  %v2452_v46 = vld [vmem:[%s67_s19] ss:$0 sm:$0xff]  ;;  %v3378_v50 = vpack.c.bf16 %v169_v41, %v166_v38  ;;  %v171_v61 = vld [vmem:[#allocation8 + $0x2a0] sm:$0xff]  ;;  %v174_v63 = vld [vmem:[#allocation8 + $0x2d8] sm:$0xff]  ;;  %v3400_v4 = vpack.c.bf16 %v158_v57, %v155_v56 }
  0x42   :  { %3371 = vmatprep.subr.bf16.mxu0 %v3370_v22  ;;  %v149_v48 = vld [vmem:[#allocation8 + $0xf0] sm:$0xff]  ;;  %3395 = vmatpush3.bf16.msra.mxu1 %v3394_v44  ;;  %v127_v59 = vsel %vm126_vm4, %v125_v47, %v2452_v46  ;;  %v178_v2 = vld [vmem:[#allocation8 + $0x318] sm:$0xff]  ;;  %v164_v8 = vld [vmem:[#allocation8 + $0x208] sm:$0xff]  ;;  %v3384_v9 = vpack.c.bf16 %v174_v63, %v171_v61 }
  0x43   :  { %v165_v51 = vld [vmem:[#allocation8 + $0x230] sm:$0xff]  ;;  %v3397_v54 = vpack.c.bf16 %v152_v49, %v149_v48  ;;  %3396 = vmatprep.subr.bf16.mxu1 %v4266_v0  ;;  %v180_v12 = vld [vmem:[#allocation8 + $0x348] sm:$0xff]  ;;  %v342_v15 = vld [vmem:[#allocation8 + $0x20] sm:$0xff] }
  0x44   :  { %v2453_v58 = vld [vmem:[%s70_s20] ss:$0 sm:$0xff]  ;;  %v3380_v60 = vpack.c.bf16 %v168_v52, %v165_v51  ;;  %v345_v17 = vld [vmem:[#allocation8 + $0x58] sm:$0xff]  ;;  %v167_v18 = vld [vmem:[#allocation8 + $0x240] sm:$0xff] }
  0x45   :  { %3373 = vmatpush1.bf16.msra.mxu0 %v3372_v32  ;;  %v181_v3 = vld [vmem:[#allocation8 + $0x350] sm:$0xff]  ;;  %v129_v6 = vsel %vm128_vm5, %v127_v59, %v2453_v58  ;;  %v170_v19 = vld [vmem:[#allocation8 + $0x278] sm:$0xff]  ;;  %v4377_v23 = vpack.c.bf16 %v345_v17, %v342_v15  ;;  %v351_v26 = vld [vmem:[#allocation8 + $0xc8] sm:$0xff] }
  0x46   :  { %3375 = vmatprep.subr.bf16.mxu0 %v3374_v36  ;;  %3398 = vmatpush3.bf16.msra.mxu1 %v3397_v54  ;;  %v2454_v5 = vld [vmem:[%s73_s21] ss:$0 sm:$0xff]  ;;  %v3386_v11 = vpack.c.bf16 %v181_v3, %v178_v2  ;;  %v341_v22 = vld [vmem:[#allocation8 + $0x18] sm:$0xff]  ;;  %v3406_v27 = vpack.c.bf16 %v170_v19, %v167_v18  ;;  %v176_v29 = vld [vmem:[#allocation8 + $0x2e8] sm:$0xff] }
  0x47   :  { %3399 = vmatprep.subr.bf16.mxu1 %v4266_v0  ;;  %v161_v7 = vld [vmem:[#allocation8 + $0x1d0] sm:$0xff]  ;;  %v131_v14 = vsel %vm130_vm6, %v129_v6, %v2454_v5  ;;  %v347_v35 = vld [vmem:[#allocation8 + $0x88] sm:$0xff]  ;;  %v350_v36 = vld [vmem:[#allocation8 + $0xc0] sm:$0xff] }
  0x48   :  { %v177_v10 = vld [vmem:[#allocation8 + $0x310] sm:$0xff]  ;;  %v3403_v16 = vpack.c.bf16 %v164_v8, %v161_v7  ;;  %v354_v37 = vld [vmem:[#allocation8 + $0x100] sm:$0xff]  ;;  %v357_v39 = vld [vmem:[#allocation8 + $0x138] sm:$0xff]  ;;  %v4396_v42 = vpack.c.bf16 %v350_v36, %v347_v35 }
  0x49   :  { %3377 = vmatpush1.bf16.msra.mxu0 %v3376_v45  ;;  %v2455_v13 = vld [vmem:[%s76_s22] ss:$0 sm:$0xff]  ;;  %v3388_v20 = vpack.c.bf16 %v180_v12, %v177_v10  ;;  %v179_v40 = vld [vmem:[#allocation8 + $0x320] sm:$0xff]  ;;  %v182_v41 = vld [vmem:[#allocation8 + $0x358] sm:$0xff]  ;;  %v4400_v43 = vpack.c.bf16 %v357_v39, %v354_v37 }
  0x4a   :  { %3379 = vmatprep.subr.bf16.mxu0 %v3378_v50  ;;  %3401 = vmatpush3.bf16.msra.mxu1 %v3400_v4  ;;  %v133_v21 = vsel %vm132_vm7, %v131_v14, %v2455_v13  ;;  %v344_v24 = vld [vmem:[#allocation8 + $0x50] sm:$0xff]  ;;  %v353_v44 = vld [vmem:[#allocation8 + $0xf8] sm:$0xff]  ;;  %v3412_v47 = vpack.c.bf16 %v182_v41, %v179_v40  ;;  %v363_v48 = vld [vmem:[#allocation8 + $0x1a8] sm:$0xff] }
  0x4b   :  { %3402 = vmatprep.subr.bf16.mxu1 %v4266_v0  ;;  %v348_v25 = vld [vmem:[#allocation8 + $0x90] sm:$0xff]  ;;  %v134_v31 = vmax.f32 %v133_v21, 0.0  ;;  %v4389_v33 = vpack.c.bf16 %v344_v24, %v341_v22  ;;  %v343_v49 = vld [vmem:[#allocation8 + $0x28] sm:$0xff]  ;;  %v346_v50 = vld [vmem:[#allocation8 + $0x60] sm:$0xff] }
  0x4c   :  { %v173_v28 = vld [vmem:[#allocation8 + $0x2b0] sm:$0xff]  ;;  %v4392_v34 = vpack.c.bf16 %v351_v26, %v348_v25  ;;  %v359_v53 = vld [vmem:[#allocation8 + $0x168] sm:$0xff]  ;;  %v362_v54 = vld [vmem:[#allocation8 + $0x1a0] sm:$0xff]  ;;  %v4409_v56 = vpack.c.bf16 %v346_v50, %v343_v49 }
  0x4d   :  { %3381 = vmatpush1.bf16.msra.mxu0 %v3380_v60  ;;  %v4383_v30 = vld [vmem:[%s5017_s1] sm:$0x1]  ;;  %v3409_v38 = vpack.c.bf16 %v176_v29, %v173_v28  ;;  %v366_v55 = vld [vmem:[#allocation8 + $0x1e0] sm:$0xff]  ;;  %v369_v57 = vld [vmem:[#allocation8 + $0x218] sm:$0xff]  ;;  %v4413_v60 = vpack.c.bf16 %v362_v54, %v359_v53 }
  0x4e   :  { %3383 = vmatprep.subr.bf16.mxu0 %v3382_v62  ;;  %3404 = vmatpush3.bf16.msra.mxu1 %v3403_v16  ;;  %v4387_v32 = vsel %vm408_vm8, %v4383_v30, 0.0  ;;  %v356_v45 = vld [vmem:[#allocation8 + $0x130] sm:$0xff]  ;;  %v349_v58 = vld [vmem:[#allocation8 + $0x98] sm:$0xff]  ;;  %v4416_v61 = vpack.c.bf16 %v369_v57, %v366_v55  ;;  %v375_v4 = vld [vmem:[#allocation8 + $0x288] sm:$0xff] }
  0x4f   :  { %3405 = vmatprep.subr.bf16.mxu1 %v4266_v0  ;;  %v360_v46 = vld [vmem:[#allocation8 + $0x170] sm:$0xff]  ;;  %v4404_v51 = vpack.c.bf16 %v356_v45, %v353_v44  ;;  %v365_v62 = vld [vmem:[#allocation8 + $0x1d8] sm:$0xff]  ;;  %v355_v5 = vld [vmem:[#allocation8 + $0x108] sm:$0xff] }
  0x50   :  { %v4407_v52 = vpack.c.bf16 %v363_v48, %v360_v46  ;;  %v352_v59 = vld [vmem:[#allocation8 + $0xd0] sm:$0xff]  ;;  %v358_v6 = vld [vmem:[#allocation8 + $0x140] sm:$0xff]  ;;  %v381_v13 = vld [vmem:[#allocation8 + $0x2f8] sm:$0xff] }
  0x51   :  { %3385 = vmatpush1.bf16.msra.mxu0 %v3384_v9  ;;  %v368_v63 = vld [vmem:[#allocation8 + $0x210] sm:$0xff]  ;;  %v4419_v3 = vpack.c.bf16 %v352_v59, %v349_v58  ;;  %v371_v9 = vld [vmem:[#allocation8 + $0x248] sm:$0xff]  ;;  %v374_v10 = vld [vmem:[#allocation8 + $0x280] sm:$0xff]  ;;  %v4431_v12 = vpack.c.bf16 %v358_v6, %v355_v5 }
  0x52   :  { %3387 = vmatprep.subr.bf16.mxu0 %v3386_v11  ;;  %3407 = vmatpush3.bf16.msra.mxu1 %v3406_v27  ;;  %v372_v2 = vld [vmem:[#allocation8 + $0x250] sm:$0xff]  ;;  %v4425_v7 = vpack.c.bf16 %v368_v63, %v365_v62  ;;  %v378_v11 = vld [vmem:[#allocation8 + $0x2c0] sm:$0xff]  ;;  %v361_v14 = vld [vmem:[#allocation8 + $0x178] sm:$0xff]  ;;  %v4435_v16 = vpack.c.bf16 %v374_v10, %v371_v9 }
  0x53   :  { %3408 = vmatprep.subr.bf16.mxu1 %v4266_v0  ;;  %v4428_v8 = vpack.c.bf16 %v375_v4, %v372_v2  ;;  %v364_v15 = vld [vmem:[#allocation8 + $0x1b0] sm:$0xff]  ;;  %v4438_v17 = vpack.c.bf16 %v381_v13, %v378_v11  ;;  %v377_v18 = vld [vmem:[#allocation8 + $0x2b8] sm:$0xff]  ;;  %v387_v22 = vld [vmem:[#allocation8 + $0x368] sm:$0xff] }
  0x54   :  { %v380_v19 = vld [vmem:[#allocation8 + $0x2f0] sm:$0xff]  ;;  %v4441_v21 = vpack.c.bf16 %v364_v15, %v361_v14  ;;  %v367_v24 = vld [vmem:[#allocation8 + $0x1e8] sm:$0xff]  ;;  %v370_v25 = vld [vmem:[#allocation8 + $0x220] sm:$0xff] }
  0x55   :  { %3389 = vmatpush1.bf16.msra.mxu0 %v3388_v20  ;;  %v384_v20 = vld [vmem:[#allocation8 + $0x330] sm:$0xff]  ;;  %v4445_v26 = vpack.c.bf16 %v380_v19, %v377_v18  ;;  %v383_v28 = vld [vmem:[#allocation8 + $0x328] sm:$0xff]  ;;  %v386_v29 = vld [vmem:[#allocation8 + $0x360] sm:$0xff] }
  0x56   :  { %3415 = vmatprep.subr.bf16.mxu0 %v4377_v23  ;;  %3410 = vmatpush3.bf16.msra.mxu1 %v3409_v38  ;;  %v4448_v27 = vpack.c.bf16 %v387_v22, %v384_v20  ;;  %v373_v35 = vld [vmem:[#allocation8 + $0x258] sm:$0xff]  ;;  %v376_v36 = vld [vmem:[#allocation8 + $0x290] sm:$0xff]  ;;  %v4455_v37 = vpack.c.bf16 %v386_v29, %v383_v28  ;;  %v379_v39 = vld [vmem:[#allocation8 + $0x2c8] sm:$0xff] }
  0x57   :  { %3411 = vmatprep.subr.bf16.mxu1 %v4266_v0  ;;  %v4459_v38 = vpack.c.bf16 %v376_v36, %v373_v35  ;;  %v382_v40 = vld [vmem:[#allocation8 + $0x300] sm:$0xff]  ;;  %v385_v44 = vld [vmem:[#allocation8 + $0x338] sm:$0xff]  ;;  %v388_v45 = vld [vmem:[#allocation8 + $0x370] sm:$0xff] }
  0x58   :  { %265 = vmatmul.mubr.f32.vlgmr.msra.gmra.mrb[0].mxu0 %v134_v31  ;;  %v4464_v41 = vpack.c.bf16 %v382_v40, %v379_v39  ;;  %v4473_v46 = vpack.c.bf16 %v388_v45, %v385_v44  ;;  %v392_v49 = vld [vmem:[#allocation8 + $0xa0] sm:$0xff]  ;;  %v393_v50 = vld [vmem:[#allocation8 + $0xd8] sm:$0xff]  ;;  %v394_v54 = vld [vmem:[#allocation8 + $0x110] sm:$0xff] }
  0x59   :  { %3417 = vmatpush1.bf16.msra.mxu0 %v4389_v33  ;;  %490 = vmatprep.mubr.f32.mxu0 %v4267_v1  ;;  %v4501_v53 = vpack.c.bf16 %v393_v50, %v392_v49  ;;  %v395_v55 = vld [vmem:[#allocation8 + $0x148] sm:$0xff]  ;;  %v396_v58 = vld [vmem:[#allocation8 + $0x180] sm:$0xff]  ;;  %v397_v59 = vld [vmem:[#allocation8 + $0x1b8] sm:$0xff] }
  0x5a   :  { %3419 = vmatprep.subr.bf16.mxu0 %v4392_v34  ;;  %3413 = vmatpush3.bf16.msra.mxu1 %v3412_v47  ;;  %v391_v47 = vld [vmem:[#allocation8 + $0x68] sm:$0xff]  ;;  %v4504_v57 = vpack.c.bf16 %v395_v55, %v394_v54  ;;  %v4509_v62 = vpack.c.bf16 %v397_v59, %v396_v58  ;;  %v398_v63 = vld [vmem:[#allocation8 + $0x1f0] sm:$0xff]  ;;  %v400_v5 = vld [vmem:[#allocation8 + $0x260] sm:$0xff] }
  0x5b   :  { %3446 = vmatprep.subr.bf16.mxu1 %v4266_v0  ;;  %v399_v2 = vld [vmem:[#allocation8 + $0x228] sm:$0xff]  ;;  %v401_v6 = vld [vmem:[#allocation8 + $0x298] sm:$0xff]  ;;  %v402_v9 = vld [vmem:[#allocation8 + $0x2d0] sm:$0xff] }
  0x5c   :  { %v4513_v4 = vpack.c.bf16 %v399_v2, %v398_v63  ;;  %v4517_v10 = vpack.c.bf16 %v401_v6, %v400_v5  ;;  %v403_v11 = vld [vmem:[#allocation8 + $0x308] sm:$0xff]  ;;  %v404_v14 = vld [vmem:[#allocation8 + $0x340] sm:$0xff]  ;;  %v405_v15 = vld [vmem:[#allocation8 + $0x378] sm:$0xff] }
  0x5d   :  { %3421 = vmatpush1.bf16.msra.mxu0 %v4396_v42  ;;  %2796 = vmatmul.mubr.f32.vlgmr.msra.gmra.mrb[0].mxu1 %v134_v31  ;;  %v4451_v31 = vpack.c.bf16 %v370_v25, %v367_v24  ;;  %v4520_v13 = vpack.c.bf16 %v403_v11, %v402_v9  ;;  %v4524_v18 = vpack.c.bf16 %v405_v15, %v404_v14  ;;  %v185_v25 = vlaneseq  ;;  %v183_v35 = vld [vmem:[%s5020_s4] sm:$0x7]  ;;  %v389_v36 = vld [vmem:[%s5020_s4 + $0x3] sm:$0x7] }
  0x5e   :  { %3423 = vmatprep.subr.bf16.mxu0 %v4400_v43  ;;  %3448 = vmatpush3.bf16.msra.mxu1 %v4409_v56 }
  0x5f   :  { %3449 = vmatprep.subr.bf16.mxu1 %v4266_v0  ;;  %2830 = vmatprep.mubr.msk.f32.mxu1 %vm4268_vm0, %v4267_v1  ;;  %v186_v28 = vshrl.u32 %v185_v25, 7 }
  0x61   :  { %3425 = vmatpush1.bf16.msra.mxu0 %v4404_v51  ;;  %v187_v29 = vsub.s32 0, %v186_v28  ;;  %v191_v39 = vsub.s32 1, %v186_v28 }
  0x62   :  { %3427 = vmatprep.subr.bf16.mxu0 %v4407_v52  ;;  %3451 = vmatpush3.bf16.msra.mxu1 %v4419_v3 }
  0x63   :  { %3452 = vmatprep.subr.bf16.mxu1 %v4266_v0  ;;  %v188_v40 = vrot.slane %v183_v35, %v187_v29  ;;  %v4535_v44 = vrot.slane %v389_v36, %v187_v29  ;;  %v192_v45 = vrot.slane %v183_v35, %v191_v39 }
  0x65   :  { %3429 = vmatpush1.bf16.msra.mxu0 %v4413_v60 }
  0x66   :  { %3431 = vmatprep.subr.bf16.mxu0 %v4416_v61  ;;  %3454 = vmatpush3.bf16.msra.mxu1 %v4431_v12 }
  0x67   :  { %3455 = vmatprep.subr.bf16.mxu1 %v4266_v0 }
  0x69   :  { %3433 = vmatpush1.bf16.msra.mxu0 %v4425_v7 }
  0x6a   :  { %3435 = vmatprep.subr.bf16.mxu0 %v4428_v8  ;;  %3457 = vmatpush3.bf16.msra.mxu1 %v4441_v21 }
  0x6b   :  { %3458 = vmatprep.subr.bf16.mxu1 %v4266_v0 }
  0x6d   :  { %3437 = vmatpush1.bf16.msra.mxu0 %v4435_v16 }
  0x6e   :  { %3439 = vmatprep.subr.bf16.mxu0 %v4438_v17  ;;  %3460 = vmatpush3.bf16.msra.mxu1 %v4451_v31 }
  0x6f   :  { %3461 = vmatprep.subr.bf16.mxu1 %v4266_v0 }
  0x71   :  { %3441 = vmatpush1.bf16.msra.mxu0 %v4445_v26 }
  0x72   :  { %3443 = vmatprep.subr.bf16.mxu0 %v4448_v27  ;;  %3463 = vmatpush3.bf16.msra.mxu1 %v4459_v38 }
  0x73   :  { %3464 = vmatprep.subr.bf16.mxu1 %v4266_v0 }
  0x75   :  { %3445 = vmatpush1.bf16.msra.mxu0 %v4455_v37 }
  0x76   :  { %3470 = vmatprep.subr.bf16.mxu0 %v4266_v0  ;;  %3466 = vmatpush3.bf16.msra.mxu1 %v4464_v41 }
  0x77   :  { %3467 = vmatprep.subr.bf16.mxu1 %v4266_v0 }
  0x78   :  { %2456 = vmatmul.mubr.msk.f32.vlgmr.msra.gmra.mrb[2].mxu0 %vm408_vm8, %v4383_v30 }
  0x79   :  { %2865 = vmatprep.mubr.msk.f32.mxu0 %vm4268_vm0, %v4267_v1 }
  0x7a   :  { %3469 = vmatpush3.bf16.msra.mxu1 %v4473_v46 }
  0x7b   :  { %3495 = vmatprep.subr.bf16.mxu1 %v4377_v23 }
  0x7d   :  { %2831 = vmatmul.mubr.msk.f32.vlgmr.msra.gmra.mrb[2].mxu1 %vm408_vm8, %v4383_v30  ;;  %v390_v30 = vld [vmem:[#allocation8 + $0x30] sm:$0xff] }
  0x7e   :  { %3497 = vmatpush1.bf16.msra.mxu1 %v4389_v33  ;;  %723 = vmatprep.mubr.f32.mxu1 %v4267_v1  ;;  %v4497_v48 = vpack.c.bf16 %v391_v47, %v390_v30  ;;  %v4537_v30 = vrot.slane %v389_v36, %v191_v39 }
  0x7f   :  { %3499 = vmatprep.subr.bf16.mxu1 %v4392_v34 }
  0x80   :  { %3472 = vmatpush3.bf16.msra.mxu0 %v4497_v48 }
  0x81   :  { %3473 = vmatprep.subr.bf16.mxu0 %v4266_v0 }
  0x82   :  { %3501 = vmatpush1.bf16.msra.mxu1 %v4396_v42 }
  0x83   :  { %3503 = vmatprep.subr.bf16.mxu1 %v4400_v43 }
  0x84   :  { %3475 = vmatpush3.bf16.msra.mxu0 %v4501_v53 }
  0x85   :  { %3476 = vmatprep.subr.bf16.mxu0 %v4266_v0 }
  0x86   :  { %3505 = vmatpush1.bf16.msra.mxu1 %v4404_v51 }
  0x87   :  { %3507 = vmatprep.subr.bf16.mxu1 %v4407_v52 }
  0x88   :  { %3478 = vmatpush3.bf16.msra.mxu0 %v4504_v57 }
  0x89   :  { %3479 = vmatprep.subr.bf16.mxu0 %v4266_v0 }
  0x8a   :  { %3509 = vmatpush1.bf16.msra.mxu1 %v4413_v60 }
  0x8b   :  { %3511 = vmatprep.subr.bf16.mxu1 %v4416_v61 }
  0x8c   :  { %3481 = vmatpush3.bf16.msra.mxu0 %v4509_v62 }
  0x8d   :  { %3482 = vmatprep.subr.bf16.mxu0 %v4266_v0 }
  0x8e   :  { %3513 = vmatpush1.bf16.msra.mxu1 %v4425_v7 }
  0x8f   :  { %3515 = vmatprep.subr.bf16.mxu1 %v4428_v8 }
  0x90   :  { %3484 = vmatpush3.bf16.msra.mxu0 %v4513_v4 }
  0x91   :  { %3485 = vmatprep.subr.bf16.mxu0 %v4266_v0 }
  0x92   :  { %3517 = vmatpush1.bf16.msra.mxu1 %v4435_v16 }
  0x93   :  { %3519 = vmatprep.subr.bf16.mxu1 %v4438_v17 }
  0x94   :  { %3487 = vmatpush3.bf16.msra.mxu0 %v4517_v10 }
  0x95   :  { %3488 = vmatprep.subr.bf16.mxu0 %v4266_v0 }
  0x96   :  { %3521 = vmatpush1.bf16.msra.mxu1 %v4445_v26 }
  0x97   :  { %3523 = vmatprep.subr.bf16.mxu1 %v4448_v27 }
  0x98   :  { %3490 = vmatpush3.bf16.msra.mxu0 %v4520_v13 }
  0x99   :  { %3491 = vmatprep.subr.bf16.mxu0 %v4266_v0 }
  0x9a   :  { %3525 = vmatpush1.bf16.msra.mxu1 %v4455_v37 }
  0x9b   :  { %3550 = vmatprep.subr.bf16.mxu1 %v4266_v0 }
  0x9c   :  { %3493 = vmatpush3.bf16.msra.mxu0 %v4524_v18 }
  0x9d   :  { %3526 = vmatprep.subr.bf16.mxu0 %v4266_v0 }
 0x12b   :  { %v266_v19 = vpop.f32.mrb[0].mxu0 }
 0x12c   :  { %v268_v20 = vpop.f32.mrb[1].mxu0  ;;  %v4539_v49 = vadd.f32 %v266_v19, %v188_v40 }
 0x12d   :  { %v4542_v55 = vadd.f32 %v268_v20, %v192_v45 }
 0x130   :  { %v337_v22 = vpop.f32.mrb[0].mxu1 }
 0x131   :  { %v2797_v24 = vpop.f32.mrb[1].mxu1 }
 0x132   :  { %v195_v24 = vsub.s32 2, %v186_v28 }
 0x134   :  { %v4547_v20 = vrot.slane %v389_v36, %v195_v24  ;;  %v196_v25 = vrot.slane %v183_v35, %v195_v24 }
 0x136   :  { %v4550_v45 = vadd.f32 %v337_v22, %v196_v25 }
 0x14b   :  { %v492_v47 = vpop.f32.mrb[2].mxu0 }
 0x14c   :  { %v493_v50 = vadd.f32 %v492_v47, %v4535_v44  ;;  %v494_v54 = vpop.f32.mrb[3].mxu0 }
 0x14d   :  { %v495_v58 = vadd.f32 %v494_v54, %v4537_v30 }
 0x14e   :  { %v567_v59 = vadd.f32 %v493_v50, %v4539_v49 }
 0x14f   :  { %v574_v63 = vadd.f32 %v495_v58, %v4542_v55 }
 0x150   :  { %v2458_v2 = vmul.f32 -1.442695, %v567_v59  ;;  %v563_v6 = vpop.f32.mrb[2].mxu1 }
 0x151   :  { %v2459_v5 = vmul.f32 -1.442695, %v574_v63  ;;  %v2832_v9 = vpop.f32.mrb[3].mxu1  ;;  %v564_v29 = vadd.f32 %v563_v6, %v4547_v20 }
 0x152   :  { %4066 = vpow2.f32 %v2458_v2 }
 0x153   :  { %4068 = vpow2.f32 %v2459_v5 }
 0x15c   :  { %v4067_v11 = vpop.eup %4066 }
 0x15d   :  { %v4069_v14 = vpop.eup %4068  ;;  %v571_v15 = vadd.f32 1.0, %v4067_v11 }
 0x15e   :  { %v578_v19 = vadd.f32 1.0, %v4069_v14 }
 0x15f   :  { %4070 = vrcp.f32 %v571_v15 }
 0x160   :  { %4072 = vrcp.f32 %v578_v19 }
 0x169   :  { %v4071_v39 = vpop.eup %4070 }
 0x16a   :  { %v4073_v40 = vpop.eup %4072  ;;  %v581_v47 = vmul.f32 %v4071_v39, %v564_v29 }
 0x16b   :  { %v586_v50 = vmul.f32 %v4073_v40, %v4387_v32  ;;  %v584_v58 = vsub.f32 1.0, %v4073_v40  ;;  %v4615_v32 = vld [vmem:[%s5020_s4 + $0x6] sm:$0x1] }
 0x16c   :  { %v582_v54 = vadd.f32 %v581_v47, %v4550_v45 }
 0x16e   :  { %4074 = vtanh.f32 %v582_v54 }
 0x178   :  { %v4075_v59 = vpop.eup %4074 }
 0x179   :  { %v585_v63 = vmul.f32 %v4075_v59, %v584_v58 }
 0x17b   :  { %v4554_v28 = vadd.f32 %v586_v50, %v585_v63 }
 0x17d   :  { %2866 = vmatmul.mubr.f32.vlgmr.msra.gmra.mrb[4].mxu0 %v4554_v28  ;;  %724 = vmatmul.mubr.f32.vlgmr.msra.gmra.mrb[4].mxu1 %v4554_v28  ;;  %v829_v54 = vrot.slane %v4554_v28, 7 }
 0x17e   :  { %3528 = vmatpush3.bf16.msra.mxu0 %v4409_v56  ;;  %2900 = vmatprep.mubr.msk.f32.mxu0 %vm4268_vm0, %v4267_v1 }
 0x17f   :  { %3529 = vmatprep.subr.bf16.mxu0 %v4266_v0  ;;  %3552 = vmatpush3.bf16.msra.mxu1 %v4497_v48 }
 0x180   :  { %3553 = vmatprep.subr.bf16.mxu1 %v4266_v0  ;;  %2935 = vmatprep.mubr.msk.f32.mxu1 %vm4268_vm0, %v4267_v1 }
 0x182   :  { %3531 = vmatpush3.bf16.msra.mxu0 %v4419_v3 }
 0x183   :  { %3532 = vmatprep.subr.bf16.mxu0 %v4266_v0  ;;  %3555 = vmatpush3.bf16.msra.mxu1 %v4501_v53 }
 0x184   :  { %3556 = vmatprep.subr.bf16.mxu1 %v4266_v0 }
 0x186   :  { %3534 = vmatpush3.bf16.msra.mxu0 %v4431_v12 }
 0x187   :  { %3535 = vmatprep.subr.bf16.mxu0 %v4266_v0  ;;  %3558 = vmatpush3.bf16.msra.mxu1 %v4504_v57 }
 0x188   :  { %3559 = vmatprep.subr.bf16.mxu1 %v4266_v0 }
 0x18a   :  { %3537 = vmatpush3.bf16.msra.mxu0 %v4441_v21 }
 0x18b   :  { %3538 = vmatprep.subr.bf16.mxu0 %v4266_v0  ;;  %3561 = vmatpush3.bf16.msra.mxu1 %v4509_v62 }
 0x18c   :  { %3562 = vmatprep.subr.bf16.mxu1 %v4266_v0 }
 0x18e   :  { %3540 = vmatpush3.bf16.msra.mxu0 %v4451_v31 }
 0x18f   :  { %3541 = vmatprep.subr.bf16.mxu0 %v4266_v0  ;;  %3564 = vmatpush3.bf16.msra.mxu1 %v4513_v4 }
 0x190   :  { %3565 = vmatprep.subr.bf16.mxu1 %v4266_v0 }
 0x192   :  { %3543 = vmatpush3.bf16.msra.mxu0 %v4459_v38 }
 0x193   :  { %3544 = vmatprep.subr.bf16.mxu0 %v4266_v0  ;;  %3567 = vmatpush3.bf16.msra.mxu1 %v4517_v10 }
 0x194   :  { %3568 = vmatprep.subr.bf16.mxu1 %v4266_v0 }
 0x196   :  { %3546 = vmatpush3.bf16.msra.mxu0 %v4464_v41 }
 0x197   :  { %3547 = vmatprep.subr.bf16.mxu0 %v4266_v0  ;;  %3570 = vmatpush3.bf16.msra.mxu1 %v4520_v13 }
 0x198   :  { %3571 = vmatprep.subr.bf16.mxu1 %v4266_v0 }
 0x19a   :  { %3549 = vmatpush3.bf16.msra.mxu0 %v4473_v46 }
 0x19b   :  { %3575 = vmatprep.subr.bf16.mxu0 %v4377_v23  ;;  %3573 = vmatpush3.bf16.msra.mxu1 %v4524_v18 }
 0x19c   :  { %3606 = vmatprep.subr.bf16.mxu1 %v4266_v0 }
 0x19d   :  { %2901 = vmatmul.mubr.f32.vlgmr.msra.gmra.mrb[6].mxu0 %v4554_v28 }
 0x19e   :  { %3577 = vmatpush1.bf16.msra.mxu0 %v4389_v33  ;;  %971 = vmatprep.mubr.f32.mxu0 %v4267_v1 }
 0x19f   :  { %3579 = vmatprep.subr.bf16.mxu0 %v4392_v34 }
 0x1a2   :  { %3581 = vmatpush1.bf16.msra.mxu0 %v4396_v42 }
 0x1a3   :  { %3583 = vmatprep.subr.bf16.mxu0 %v4400_v43 }
 0x1a6   :  { %3585 = vmatpush1.bf16.msra.mxu0 %v4404_v51 }
 0x1a7   :  { %3587 = vmatprep.subr.bf16.mxu0 %v4407_v52 }
 0x1aa   :  { %3589 = vmatpush1.bf16.msra.mxu0 %v4413_v60 }
 0x1ab   :  { %3591 = vmatprep.subr.bf16.mxu0 %v4416_v61 }
 0x1ae   :  { %3593 = vmatpush1.bf16.msra.mxu0 %v4425_v7 }
 0x1af   :  { %3595 = vmatprep.subr.bf16.mxu0 %v4428_v8 }
 0x1b2   :  { %3597 = vmatpush1.bf16.msra.mxu0 %v4435_v16 }
 0x1b3   :  { %3599 = vmatprep.subr.bf16.mxu0 %v4438_v17 }
 0x1b6   :  { %3601 = vmatpush1.bf16.msra.mxu0 %v4445_v26 }
 0x1b7   :  { %3603 = vmatprep.subr.bf16.mxu0 %v4448_v27 }
 0x1ba   :  { %3605 = vmatpush1.bf16.msra.mxu0 %v4455_v37 }
 0x1bb   :  { %3630 = vmatprep.subr.bf16.mxu0 %v4266_v0 }
 0x250   :  { %v654_v22 = vpop.f32.mrb[4].mxu0  ;;  %v725_v35 = vpop.f32.mrb[4].mxu1 }
 0x251   :  { %v655_v36 = vadd.f32 %v654_v22, %v4615_v32  ;;  %v726_v2 = vadd.f32 %v725_v35, %v4535_v44  ;;  %v2867_v5 = vpop.f32.mrb[5].mxu0  ;;  %v727_v6 = vpop.f32.mrb[5].mxu1 }
 0x252   :  { %v728_v9 = vadd.f32 %v727_v6, %v4537_v30 }
 0x253   :  { %658 = vst [vmem:[#allocation2] sm:$0x1] %v655_v36  ;;  %v801_v11 = vrot.slane %v726_v2, 7 }
 0x254   :  { %v811_v14 = vrot.slane %v728_v9, 7 }
 0x255   :  { %v803_v15 = vadd.f32 %v801_v11, %v4539_v49 }
 0x256   :  { %v813_v19 = vadd.f32 %v811_v14, %v4542_v55 }
 0x257   :  { %v2460_v24 = vmul.f32 -1.442695, %v803_v15 }
 0x258   :  { %v2461_v25 = vmul.f32 -1.442695, %v813_v19 }
 0x259   :  { %4076 = vpow2.f32 %v2460_v24 }
 0x25a   :  { %4078 = vpow2.f32 %v2461_v25 }
 0x263   :  { %v4077_v29 = vpop.eup %4076 }
 0x264   :  { %v4079_v39 = vpop.eup %4078  ;;  %v807_v47 = vadd.f32 1.0, %v4077_v29 }
 0x265   :  { %v817_v40 = vadd.f32 1.0, %v4079_v39 }
 0x267   :  { %4080 = vrcp.f32 %v817_v40 }
 0x268   :  { %4082 = vrcp.f32 %v807_v47 }
 0x270   :  { %v796_v50 = vpop.f32.mrb[6].mxu0 }
 0x271   :  { %v4081_v58 = vpop.eup %4080  ;;  %v797_v59 = vadd.f32 %v796_v50, %v4547_v20  ;;  %v2902_v63 = vpop.f32.mrb[7].mxu0 }
 0x272   :  { %v831_v22 = vmul.f32 %v4081_v58, %v829_v54  ;;  %v4083_v36 = vpop.eup %4082  ;;  %v826_v6 = vsub.f32 1.0, %v4081_v58 }
 0x273   :  { %v821_v35 = vrot.slane %v797_v59, 7 }
 0x275   :  { %v823_v2 = vmul.f32 %v4083_v36, %v821_v35 }
 0x277   :  { %v824_v5 = vadd.f32 %v823_v2, %v4550_v45 }
 0x279   :  { %4084 = vtanh.f32 %v824_v5 }
 0x283   :  { %v4085_v9 = vpop.eup %4084 }
 0x284   :  { %v827_v11 = vmul.f32 %v4085_v9, %v826_v6 }
 0x286   :  { %v4625_v14 = vadd.f32 %v831_v22, %v827_v11 }
 0x288   :  { %v834_v15 = vrot.slane %v4625_v14, 1  ;;  %v1076_v5 = vrot.slane %v4625_v14, 7 }
 0x28a   :  { %2936 = vmatmul.mubr.f32.vlgmr.msra.gmra.mrb[6].mxu1 %v834_v15  ;;  %972 = vmatmul.mubr.f32.vlgmr.msra.gmra.mrb[8].mxu0 %v834_v15 }
 0x28b   :  { %3608 = vmatpush3.bf16.msra.mxu1 %v4409_v56  ;;  %2970 = vmatprep.mubr.msk.f32.mxu1 %vm4268_vm0, %v4267_v1 }
 0x28c   :  { %3609 = vmatprep.subr.bf16.mxu1 %v4266_v0  ;;  %3632 = vmatpush3.bf16.msra.mxu0 %v4497_v48 }
 0x28d   :  { %3633 = vmatprep.subr.bf16.mxu0 %v4266_v0  ;;  %3005 = vmatprep.mubr.msk.f32.mxu0 %vm4268_vm0, %v4267_v1 }
 0x28f   :  { %3611 = vmatpush3.bf16.msra.mxu1 %v4419_v3 }
 0x290   :  { %3612 = vmatprep.subr.bf16.mxu1 %v4266_v0  ;;  %3635 = vmatpush3.bf16.msra.mxu0 %v4501_v53 }
 0x291   :  { %3636 = vmatprep.subr.bf16.mxu0 %v4266_v0 }
 0x293   :  { %3614 = vmatpush3.bf16.msra.mxu1 %v4431_v12 }
 0x294   :  { %3615 = vmatprep.subr.bf16.mxu1 %v4266_v0  ;;  %3638 = vmatpush3.bf16.msra.mxu0 %v4504_v57 }
 0x295   :  { %3639 = vmatprep.subr.bf16.mxu0 %v4266_v0 }
 0x297   :  { %3617 = vmatpush3.bf16.msra.mxu1 %v4441_v21 }
 0x298   :  { %3618 = vmatprep.subr.bf16.mxu1 %v4266_v0  ;;  %3641 = vmatpush3.bf16.msra.mxu0 %v4509_v62 }
 0x299   :  { %3642 = vmatprep.subr.bf16.mxu0 %v4266_v0 }
 0x29b   :  { %3620 = vmatpush3.bf16.msra.mxu1 %v4451_v31 }
 0x29c   :  { %3621 = vmatprep.subr.bf16.mxu1 %v4266_v0  ;;  %3644 = vmatpush3.bf16.msra.mxu0 %v4513_v4 }
 0x29d   :  { %3645 = vmatprep.subr.bf16.mxu0 %v4266_v0 }
 0x29f   :  { %3623 = vmatpush3.bf16.msra.mxu1 %v4459_v38 }
 0x2a0   :  { %3624 = vmatprep.subr.bf16.mxu1 %v4266_v0  ;;  %3647 = vmatpush3.bf16.msra.mxu0 %v4517_v10 }
 0x2a1   :  { %3648 = vmatprep.subr.bf16.mxu0 %v4266_v0 }
 0x2a3   :  { %3626 = vmatpush3.bf16.msra.mxu1 %v4464_v41 }
 0x2a4   :  { %3627 = vmatprep.subr.bf16.mxu1 %v4266_v0  ;;  %3650 = vmatpush3.bf16.msra.mxu0 %v4520_v13 }
 0x2a5   :  { %3651 = vmatprep.subr.bf16.mxu0 %v4266_v0 }
 0x2a7   :  { %3629 = vmatpush3.bf16.msra.mxu1 %v4473_v46 }
 0x2a8   :  { %3655 = vmatprep.subr.bf16.mxu1 %v4377_v23  ;;  %3653 = vmatpush3.bf16.msra.mxu0 %v4524_v18 }
 0x2a9   :  { %3686 = vmatprep.subr.bf16.mxu0 %v4266_v0 }
 0x2aa   :  { %2971 = vmatmul.mubr.f32.vlgmr.msra.gmra.mrb[8].mxu1 %v834_v15 }
 0x2ab   :  { %3657 = vmatpush1.bf16.msra.mxu1 %v4389_v33  ;;  %1218 = vmatprep.mubr.f32.mxu1 %v4267_v1 }
 0x2ac   :  { %3659 = vmatprep.subr.bf16.mxu1 %v4392_v34 }
 0x2af   :  { %3661 = vmatpush1.bf16.msra.mxu1 %v4396_v42 }
 0x2b0   :  { %3663 = vmatprep.subr.bf16.mxu1 %v4400_v43 }
 0x2b3   :  { %3665 = vmatpush1.bf16.msra.mxu1 %v4404_v51 }
 0x2b4   :  { %3667 = vmatprep.subr.bf16.mxu1 %v4407_v52 }
 0x2b7   :  { %3669 = vmatpush1.bf16.msra.mxu1 %v4413_v60 }
 0x2b8   :  { %3671 = vmatprep.subr.bf16.mxu1 %v4416_v61 }
 0x2bb   :  { %3673 = vmatpush1.bf16.msra.mxu1 %v4425_v7 }
 0x2bc   :  { %3675 = vmatprep.subr.bf16.mxu1 %v4428_v8 }
 0x2bf   :  { %3677 = vmatpush1.bf16.msra.mxu1 %v4435_v16 }
 0x2c0   :  { %3679 = vmatprep.subr.bf16.mxu1 %v4438_v17 }
 0x2c3   :  { %3681 = vmatpush1.bf16.msra.mxu1 %v4445_v26 }
 0x2c4   :  { %3683 = vmatprep.subr.bf16.mxu1 %v4448_v27 }
 0x2c7   :  { %3685 = vmatpush1.bf16.msra.mxu1 %v4455_v37 }
 0x2c8   :  { %3710 = vmatprep.subr.bf16.mxu1 %v4266_v0 }
 0x35d   :  { %v902_v28 = vpop.f32.mrb[6].mxu1  ;;  %v973_v19 = vpop.f32.mrb[8].mxu0 }
 0x35e   :  { %v903_v24 = vadd.f32 %v902_v28, %v4615_v32  ;;  %v974_v25 = vadd.f32 %v973_v19, %v4535_v44  ;;  %v2937_v29 = vpop.f32.mrb[7].mxu1  ;;  %v975_v39 = vpop.f32.mrb[9].mxu0 }
 0x35f   :  { %v976_v40 = vadd.f32 %v975_v39, %v4537_v30 }
 0x360   :  { %906 = vst [vmem:[#allocation2 + $0x1] sm:$0x1] %v903_v24  ;;  %v1049_v47 = vrot.slane %v974_v25, 6 }
 0x361   :  { %v1059_v50 = vrot.slane %v976_v40, 6 }
 0x362   :  { %v1051_v54 = vadd.f32 %v1049_v47, %v4539_v49 }
 0x363   :  { %v1061_v58 = vadd.f32 %v1059_v50, %v4542_v55 }
 0x364   :  { %v2462_v59 = vmul.f32 -1.442695, %v1051_v54 }
 0x365   :  { %v2463_v63 = vmul.f32 -1.442695, %v1061_v58 }
 0x366   :  { %4086 = vpow2.f32 %v2462_v59 }
 0x367   :  { %4088 = vpow2.f32 %v2463_v63 }
 0x370   :  { %v4087_v22 = vpop.eup %4086 }
 0x371   :  { %v4089_v35 = vpop.eup %4088  ;;  %v1055_v2 = vadd.f32 1.0, %v4087_v22 }
 0x372   :  { %v1065_v36 = vadd.f32 1.0, %v4089_v35 }
 0x374   :  { %4090 = vrcp.f32 %v1065_v36 }
 0x375   :  { %4092 = vrcp.f32 %v1055_v2 }
 0x37d   :  { %v1044_v6 = vpop.f32.mrb[8].mxu1 }
 0x37e   :  { %v4091_v9 = vpop.eup %4090  ;;  %v1045_v11 = vadd.f32 %v1044_v6, %v4547_v20  ;;  %v2972_v15 = vpop.f32.mrb[9].mxu1 }
 0x37f   :  { %v1078_v28 = vmul.f32 %v4091_v9, %v1076_v5  ;;  %v4093_v24 = vpop.eup %4092  ;;  %v1074_v39 = vsub.f32 1.0, %v4091_v9 }
 0x380   :  { %v1069_v19 = vrot.slane %v1045_v11, 6 }
 0x382   :  { %v1071_v25 = vmul.f32 %v4093_v24, %v1069_v19 }
 0x384   :  { %v1072_v29 = vadd.f32 %v1071_v25, %v4550_v45 }
 0x386   :  { %4094 = vtanh.f32 %v1072_v29 }
 0x390   :  { %v4095_v40 = vpop.eup %4094 }
 0x391   :  { %v1075_v47 = vmul.f32 %v4095_v40, %v1074_v39 }
 0x393   :  { %v4689_v50 = vadd.f32 %v1078_v28, %v1075_v47 }
 0x395   :  { %v1081_v54 = vrot.slane %v4689_v50, 2  ;;  %v1323_v29 = vrot.slane %v4689_v50, 7 }
 0x397   :  { %3006 = vmatmul.mubr.f32.vlgmr.msra.gmra.mrb[10].mxu0 %v1081_v54  ;;  %1219 = vmatmul.mubr.f32.vlgmr.msra.gmra.mrb[10].mxu1 %v1081_v54 }
 0x398   :  { %3688 = vmatpush3.bf16.msra.mxu0 %v4409_v56  ;;  %3040 = vmatprep.mubr.msk.f32.mxu0 %vm4268_vm0, %v4267_v1 }
 0x399   :  { %3689 = vmatprep.subr.bf16.mxu0 %v4266_v0  ;;  %3712 = vmatpush3.bf16.msra.mxu1 %v4497_v48 }
 0x39a   :  { %3713 = vmatprep.subr.bf16.mxu1 %v4266_v0  ;;  %3075 = vmatprep.mubr.msk.f32.mxu1 %vm4268_vm0, %v4267_v1 }
 0x39c   :  { %3691 = vmatpush3.bf16.msra.mxu0 %v4419_v3 }
 0x39d   :  { %3692 = vmatprep.subr.bf16.mxu0 %v4266_v0  ;;  %3715 = vmatpush3.bf16.msra.mxu1 %v4501_v53 }
 0x39e   :  { %3716 = vmatprep.subr.bf16.mxu1 %v4266_v0 }
 0x3a0   :  { %3694 = vmatpush3.bf16.msra.mxu0 %v4431_v12 }
 0x3a1   :  { %3695 = vmatprep.subr.bf16.mxu0 %v4266_v0  ;;  %3718 = vmatpush3.bf16.msra.mxu1 %v4504_v57 }
 0x3a2   :  { %3719 = vmatprep.subr.bf16.mxu1 %v4266_v0 }
 0x3a4   :  { %3697 = vmatpush3.bf16.msra.mxu0 %v4441_v21 }
 0x3a5   :  { %3698 = vmatprep.subr.bf16.mxu0 %v4266_v0  ;;  %3721 = vmatpush3.bf16.msra.mxu1 %v4509_v62 }
 0x3a6   :  { %3722 = vmatprep.subr.bf16.mxu1 %v4266_v0 }
 0x3a8   :  { %3700 = vmatpush3.bf16.msra.mxu0 %v4451_v31 }
 0x3a9   :  { %3701 = vmatprep.subr.bf16.mxu0 %v4266_v0  ;;  %3724 = vmatpush3.bf16.msra.mxu1 %v4513_v4 }
 0x3aa   :  { %3725 = vmatprep.subr.bf16.mxu1 %v4266_v0 }
 0x3ac   :  { %3703 = vmatpush3.bf16.msra.mxu0 %v4459_v38 }
 0x3ad   :  { %3704 = vmatprep.subr.bf16.mxu0 %v4266_v0  ;;  %3727 = vmatpush3.bf16.msra.mxu1 %v4517_v10 }
 0x3ae   :  { %3728 = vmatprep.subr.bf16.mxu1 %v4266_v0 }
 0x3b0   :  { %3706 = vmatpush3.bf16.msra.mxu0 %v4464_v41 }
 0x3b1   :  { %3707 = vmatprep.subr.bf16.mxu0 %v4266_v0  ;;  %3730 = vmatpush3.bf16.msra.mxu1 %v4520_v13 }
 0x3b2   :  { %3731 = vmatprep.subr.bf16.mxu1 %v4266_v0 }
 0x3b4   :  { %3709 = vmatpush3.bf16.msra.mxu0 %v4473_v46 }
 0x3b5   :  { %3735 = vmatprep.subr.bf16.mxu0 %v4377_v23  ;;  %3733 = vmatpush3.bf16.msra.mxu1 %v4524_v18 }
 0x3b6   :  { %3766 = vmatprep.subr.bf16.mxu1 %v4266_v0 }
 0x3b7   :  { %3041 = vmatmul.mubr.f32.vlgmr.msra.gmra.mrb[12].mxu0 %v1081_v54 }
 0x3b8   :  { %3737 = vmatpush1.bf16.msra.mxu0 %v4389_v33  ;;  %1465 = vmatprep.mubr.f32.mxu0 %v4267_v1 }
 0x3b9   :  { %3739 = vmatprep.subr.bf16.mxu0 %v4392_v34 }
 0x3bc   :  { %3741 = vmatpush1.bf16.msra.mxu0 %v4396_v42 }
 0x3bd   :  { %3743 = vmatprep.subr.bf16.mxu0 %v4400_v43 }
 0x3c0   :  { %3745 = vmatpush1.bf16.msra.mxu0 %v4404_v51 }
 0x3c1   :  { %3747 = vmatprep.subr.bf16.mxu0 %v4407_v52 }
 0x3c4   :  { %3749 = vmatpush1.bf16.msra.mxu0 %v4413_v60 }
 0x3c5   :  { %3751 = vmatprep.subr.bf16.mxu0 %v4416_v61 }
 0x3c8   :  { %3753 = vmatpush1.bf16.msra.mxu0 %v4425_v7 }
 0x3c9   :  { %3755 = vmatprep.subr.bf16.mxu0 %v4428_v8 }
 0x3cc   :  { %3757 = vmatpush1.bf16.msra.mxu0 %v4435_v16 }
 0x3cd   :  { %3759 = vmatprep.subr.bf16.mxu0 %v4438_v17 }
 0x3d0   :  { %3761 = vmatpush1.bf16.msra.mxu0 %v4445_v26 }
 0x3d1   :  { %3763 = vmatprep.subr.bf16.mxu0 %v4448_v27 }
 0x3d4   :  { %3765 = vmatpush1.bf16.msra.mxu0 %v4455_v37 }
 0x3d5   :  { %3790 = vmatprep.subr.bf16.mxu0 %v4266_v0 }
 0x46a   :  { %v1149_v14 = vpop.f32.mrb[10].mxu0  ;;  %v1220_v58 = vpop.f32.mrb[10].mxu1 }
 0x46b   :  { %v1150_v59 = vadd.f32 %v1149_v14, %v4615_v32  ;;  %v1221_v63 = vadd.f32 %v1220_v58, %v4535_v44  ;;  %v3007_v22 = vpop.f32.mrb[11].mxu0  ;;  %v1222_v35 = vpop.f32.mrb[11].mxu1 }
 0x46c   :  { %v1223_v36 = vadd.f32 %v1222_v35, %v4537_v30 }
 0x46d   :  { %1153 = vst [vmem:[#allocation2 + $0x2] sm:$0x1] %v1150_v59  ;;  %v1296_v2 = vrot.slane %v1221_v63, 5 }
 0x46e   :  { %v1306_v5 = vrot.slane %v1223_v36, 5 }
 0x46f   :  { %v1298_v6 = vadd.f32 %v1296_v2, %v4539_v49 }
 0x470   :  { %v1308_v9 = vadd.f32 %v1306_v5, %v4542_v55 }
 0x471   :  { %v2464_v11 = vmul.f32 -1.442695, %v1298_v6 }
 0x472   :  { %v2465_v15 = vmul.f32 -1.442695, %v1308_v9 }
 0x473   :  { %4096 = vpow2.f32 %v2464_v11 }
 0x474   :  { %4098 = vpow2.f32 %v2465_v15 }
 0x47d   :  { %v4097_v28 = vpop.eup %4096 }
 0x47e   :  { %v4099_v19 = vpop.eup %4098  ;;  %v1302_v25 = vadd.f32 1.0, %v4097_v28 }
 0x47f   :  { %v1312_v24 = vadd.f32 1.0, %v4099_v19 }
 0x481   :  { %4100 = vrcp.f32 %v1312_v24 }
 0x482   :  { %4102 = vrcp.f32 %v1302_v25 }
 0x48a   :  { %v1291_v39 = vpop.f32.mrb[12].mxu0 }
 0x48b   :  { %v4101_v40 = vpop.eup %4100  ;;  %v1292_v47 = vadd.f32 %v1291_v39, %v4547_v20  ;;  %v3042_v54 = vpop.f32.mrb[13].mxu0 }
 0x48c   :  { %v1325_v14 = vmul.f32 %v4101_v40, %v1323_v29  ;;  %v4103_v59 = vpop.eup %4102  ;;  %v1321_v35 = vsub.f32 1.0, %v4101_v40 }
 0x48d   :  { %v1316_v58 = vrot.slane %v1292_v47, 5 }
 0x48f   :  { %v1318_v63 = vmul.f32 %v4103_v59, %v1316_v58 }
 0x491   :  { %v1319_v22 = vadd.f32 %v1318_v63, %v4550_v45 }
 0x493   :  { %4104 = vtanh.f32 %v1319_v22 }
 0x49d   :  { %v4105_v36 = vpop.eup %4104 }
 0x49e   :  { %v1322_v2 = vmul.f32 %v4105_v36, %v1321_v35 }
 0x4a0   :  { %v4753_v5 = vadd.f32 %v1325_v14, %v1322_v2 }
 0x4a2   :  { %v1328_v6 = vrot.slane %v4753_v5, 3  ;;  %v1570_v22 = vrot.slane %v4753_v5, 7 }
 0x4a4   :  { %3076 = vmatmul.mubr.f32.vlgmr.msra.gmra.mrb[12].mxu1 %v1328_v6  ;;  %1466 = vmatmul.mubr.f32.vlgmr.msra.gmra.mrb[14].mxu0 %v1328_v6 }
 0x4a5   :  { %3768 = vmatpush3.bf16.msra.mxu1 %v4409_v56  ;;  %3110 = vmatprep.mubr.msk.f32.mxu1 %vm4268_vm0, %v4267_v1 }
 0x4a6   :  { %3769 = vmatprep.subr.bf16.mxu1 %v4266_v0  ;;  %3792 = vmatpush3.bf16.msra.mxu0 %v4497_v48 }
 0x4a7   :  { %3793 = vmatprep.subr.bf16.mxu0 %v4266_v0  ;;  %3145 = vmatprep.mubr.msk.f32.mxu0 %vm4268_vm0, %v4267_v1 }
 0x4a9   :  { %3771 = vmatpush3.bf16.msra.mxu1 %v4419_v3 }
 0x4aa   :  { %3772 = vmatprep.subr.bf16.mxu1 %v4266_v0  ;;  %3795 = vmatpush3.bf16.msra.mxu0 %v4501_v53 }
 0x4ab   :  { %3796 = vmatprep.subr.bf16.mxu0 %v4266_v0 }
 0x4ad   :  { %3774 = vmatpush3.bf16.msra.mxu1 %v4431_v12 }
 0x4ae   :  { %3775 = vmatprep.subr.bf16.mxu1 %v4266_v0  ;;  %3798 = vmatpush3.bf16.msra.mxu0 %v4504_v57 }
 0x4af   :  { %3799 = vmatprep.subr.bf16.mxu0 %v4266_v0 }
 0x4b1   :  { %3777 = vmatpush3.bf16.msra.mxu1 %v4441_v21 }
 0x4b2   :  { %3778 = vmatprep.subr.bf16.mxu1 %v4266_v0  ;;  %3801 = vmatpush3.bf16.msra.mxu0 %v4509_v62 }
 0x4b3   :  { %3802 = vmatprep.subr.bf16.mxu0 %v4266_v0 }
 0x4b5   :  { %3780 = vmatpush3.bf16.msra.mxu1 %v4451_v31 }
 0x4b6   :  { %3781 = vmatprep.subr.bf16.mxu1 %v4266_v0  ;;  %3804 = vmatpush3.bf16.msra.mxu0 %v4513_v4 }
 0x4b7   :  { %3805 = vmatprep.subr.bf16.mxu0 %v4266_v0 }
 0x4b9   :  { %3783 = vmatpush3.bf16.msra.mxu1 %v4459_v38 }
 0x4ba   :  { %3784 = vmatprep.subr.bf16.mxu1 %v4266_v0  ;;  %3807 = vmatpush3.bf16.msra.mxu0 %v4517_v10 }
 0x4bb   :  { %3808 = vmatprep.subr.bf16.mxu0 %v4266_v0 }
 0x4bd   :  { %3786 = vmatpush3.bf16.msra.mxu1 %v4464_v41 }
 0x4be   :  { %3787 = vmatprep.subr.bf16.mxu1 %v4266_v0  ;;  %3810 = vmatpush3.bf16.msra.mxu0 %v4520_v13 }
 0x4bf   :  { %3811 = vmatprep.subr.bf16.mxu0 %v4266_v0 }
 0x4c1   :  { %3789 = vmatpush3.bf16.msra.mxu1 %v4473_v46 }
 0x4c2   :  { %3815 = vmatprep.subr.bf16.mxu1 %v4377_v23  ;;  %3813 = vmatpush3.bf16.msra.mxu0 %v4524_v18 }
 0x4c3   :  { %3846 = vmatprep.subr.bf16.mxu0 %v4266_v0 }
 0x4c4   :  { %3111 = vmatmul.mubr.f32.vlgmr.msra.gmra.mrb[14].mxu1 %v1328_v6 }
 0x4c5   :  { %3817 = vmatpush1.bf16.msra.mxu1 %v4389_v33  ;;  %1712 = vmatprep.mubr.f32.mxu1 %v4267_v1 }
 0x4c6   :  { %3819 = vmatprep.subr.bf16.mxu1 %v4392_v34 }
 0x4c9   :  { %3821 = vmatpush1.bf16.msra.mxu1 %v4396_v42 }
 0x4ca   :  { %3823 = vmatprep.subr.bf16.mxu1 %v4400_v43 }
 0x4cd   :  { %3825 = vmatpush1.bf16.msra.mxu1 %v4404_v51 }
 0x4ce   :  { %3827 = vmatprep.subr.bf16.mxu1 %v4407_v52 }
 0x4d1   :  { %3829 = vmatpush1.bf16.msra.mxu1 %v4413_v60 }
 0x4d2   :  { %3831 = vmatprep.subr.bf16.mxu1 %v4416_v61 }
 0x4d5   :  { %3833 = vmatpush1.bf16.msra.mxu1 %v4425_v7 }
 0x4d6   :  { %3835 = vmatprep.subr.bf16.mxu1 %v4428_v8 }
 0x4d9   :  { %3837 = vmatpush1.bf16.msra.mxu1 %v4435_v16 }
 0x4da   :  { %3839 = vmatprep.subr.bf16.mxu1 %v4438_v17 }
 0x4dd   :  { %3841 = vmatpush1.bf16.msra.mxu1 %v4445_v26 }
 0x4de   :  { %3843 = vmatprep.subr.bf16.mxu1 %v4448_v27 }
 0x4e1   :  { %3845 = vmatpush1.bf16.msra.mxu1 %v4455_v37 }
 0x4e2   :  { %3870 = vmatprep.subr.bf16.mxu1 %v4266_v0 }
 0x577   :  { %v1396_v50 = vpop.f32.mrb[12].mxu1  ;;  %v1467_v9 = vpop.f32.mrb[14].mxu0 }
 0x578   :  { %v1397_v11 = vadd.f32 %v1396_v50, %v4615_v32  ;;  %v1468_v15 = vadd.f32 %v1467_v9, %v4535_v44  ;;  %v3077_v28 = vpop.f32.mrb[13].mxu1  ;;  %v1469_v19 = vpop.f32.mrb[15].mxu0 }
 0x579   :  { %v1470_v24 = vadd.f32 %v1469_v19, %v4537_v30 }
 0x57a   :  { %1400 = vst [vmem:[#allocation2 + $0x3] sm:$0x1] %v1397_v11  ;;  %v1543_v25 = vrot.slane %v1468_v15, 4 }
 0x57b   :  { %v1553_v29 = vrot.slane %v1470_v24, 4 }
 0x57c   :  { %v1545_v39 = vadd.f32 %v1543_v25, %v4539_v49 }
 0x57d   :  { %v1555_v40 = vadd.f32 %v1553_v29, %v4542_v55 }
 0x57e   :  { %v2466_v47 = vmul.f32 -1.442695, %v1545_v39 }
 0x57f   :  { %v2467_v54 = vmul.f32 -1.442695, %v1555_v40 }
 0x580   :  { %4106 = vpow2.f32 %v2466_v47 }
 0x581   :  { %4108 = vpow2.f32 %v2467_v54 }
 0x58a   :  { %v4107_v14 = vpop.eup %4106 }
 0x58b   :  { %v4109_v58 = vpop.eup %4108  ;;  %v1549_v63 = vadd.f32 1.0, %v4107_v14 }
 0x58c   :  { %v1559_v59 = vadd.f32 1.0, %v4109_v58 }
 0x58e   :  { %4110 = vrcp.f32 %v1559_v59 }
 0x58f   :  { %4112 = vrcp.f32 %v1549_v63 }
 0x597   :  { %v1538_v35 = vpop.f32.mrb[14].mxu1 }
 0x598   :  { %v4111_v36 = vpop.eup %4110  ;;  %v1539_v2 = vadd.f32 %v1538_v35, %v4547_v20  ;;  %v3112_v6 = vpop.f32.mrb[15].mxu1 }
 0x599   :  { %v1572_v50 = vmul.f32 %v4111_v36, %v1570_v22  ;;  %v4113_v11 = vpop.eup %4112  ;;  %v1568_v19 = vsub.f32 1.0, %v4111_v36 }
 0x59a   :  { %v1563_v9 = vrot.slane %v1539_v2, 4 }
 0x59c   :  { %v1565_v15 = vmul.f32 %v4113_v11, %v1563_v9 }
 0x59e   :  { %v1566_v28 = vadd.f32 %v1565_v15, %v4550_v45 }
 0x5a0   :  { %4114 = vtanh.f32 %v1566_v28 }
 0x5aa   :  { %v4115_v24 = vpop.eup %4114 }
 0x5ab   :  { %v1569_v25 = vmul.f32 %v4115_v24, %v1568_v19 }
 0x5ad   :  { %v4817_v29 = vadd.f32 %v1572_v50, %v1569_v25 }
 0x5af   :  { %v1575_v39 = vrot.slane %v4817_v29, 4  ;;  %v1817_v28 = vrot.slane %v4817_v29, 7 }
 0x5b1   :  { %3146 = vmatmul.mubr.f32.vlgmr.msra.gmra.mrb[16].mxu0 %v1575_v39  ;;  %1713 = vmatmul.mubr.f32.vlgmr.msra.gmra.mrb[16].mxu1 %v1575_v39 }
 0x5b2   :  { %3848 = vmatpush3.bf16.msra.mxu0 %v4409_v56  ;;  %3180 = vmatprep.mubr.msk.f32.mxu0 %vm4268_vm0, %v4267_v1 }
 0x5b3   :  { %3849 = vmatprep.subr.bf16.mxu0 %v4266_v0  ;;  %3872 = vmatpush3.bf16.msra.mxu1 %v4497_v48 }
 0x5b4   :  { %3873 = vmatprep.subr.bf16.mxu1 %v4266_v0  ;;  %3215 = vmatprep.mubr.msk.f32.mxu1 %vm4268_vm0, %v4267_v1 }
 0x5b6   :  { %3851 = vmatpush3.bf16.msra.mxu0 %v4419_v3 }
 0x5b7   :  { %3852 = vmatprep.subr.bf16.mxu0 %v4266_v0  ;;  %3875 = vmatpush3.bf16.msra.mxu1 %v4501_v53 }
 0x5b8   :  { %3876 = vmatprep.subr.bf16.mxu1 %v4266_v0 }
 0x5ba   :  { %3854 = vmatpush3.bf16.msra.mxu0 %v4431_v12 }
 0x5bb   :  { %3855 = vmatprep.subr.bf16.mxu0 %v4266_v0  ;;  %3878 = vmatpush3.bf16.msra.mxu1 %v4504_v57 }
 0x5bc   :  { %3879 = vmatprep.subr.bf16.mxu1 %v4266_v0 }
 0x5be   :  { %3857 = vmatpush3.bf16.msra.mxu0 %v4441_v21 }
 0x5bf   :  { %3858 = vmatprep.subr.bf16.mxu0 %v4266_v0  ;;  %3881 = vmatpush3.bf16.msra.mxu1 %v4509_v62 }
 0x5c0   :  { %3882 = vmatprep.subr.bf16.mxu1 %v4266_v0 }
 0x5c2   :  { %3860 = vmatpush3.bf16.msra.mxu0 %v4451_v31 }
 0x5c3   :  { %3861 = vmatprep.subr.bf16.mxu0 %v4266_v0  ;;  %3884 = vmatpush3.bf16.msra.mxu1 %v4513_v4 }
 0x5c4   :  { %3885 = vmatprep.subr.bf16.mxu1 %v4266_v0 }
 0x5c6   :  { %3863 = vmatpush3.bf16.msra.mxu0 %v4459_v38 }
 0x5c7   :  { %3864 = vmatprep.subr.bf16.mxu0 %v4266_v0  ;;  %3887 = vmatpush3.bf16.msra.mxu1 %v4517_v10 }
 0x5c8   :  { %3888 = vmatprep.subr.bf16.mxu1 %v4266_v0 }
 0x5ca   :  { %3866 = vmatpush3.bf16.msra.mxu0 %v4464_v41 }
 0x5cb   :  { %3867 = vmatprep.subr.bf16.mxu0 %v4266_v0  ;;  %3890 = vmatpush3.bf16.msra.mxu1 %v4520_v13 }
 0x5cc   :  { %3891 = vmatprep.subr.bf16.mxu1 %v4266_v0 }
 0x5ce   :  { %3869 = vmatpush3.bf16.msra.mxu0 %v4473_v46 }
 0x5cf   :  { %3895 = vmatprep.subr.bf16.mxu0 %v4377_v23  ;;  %3893 = vmatpush3.bf16.msra.mxu1 %v4524_v18 }
 0x5d0   :  { %3926 = vmatprep.subr.bf16.mxu1 %v4266_v0 }
 0x5d1   :  { %3181 = vmatmul.mubr.f32.vlgmr.msra.gmra.mrb[18].mxu0 %v1575_v39 }
 0x5d2   :  { %3897 = vmatpush1.bf16.msra.mxu0 %v4389_v33  ;;  %1959 = vmatprep.mubr.f32.mxu0 %v4267_v1 }
 0x5d3   :  { %3899 = vmatprep.subr.bf16.mxu0 %v4392_v34 }
 0x5d6   :  { %3901 = vmatpush1.bf16.msra.mxu0 %v4396_v42 }
 0x5d7   :  { %3903 = vmatprep.subr.bf16.mxu0 %v4400_v43 }
 0x5da   :  { %3905 = vmatpush1.bf16.msra.mxu0 %v4404_v51 }
 0x5db   :  { %3907 = vmatprep.subr.bf16.mxu0 %v4407_v52 }
 0x5de   :  { %3909 = vmatpush1.bf16.msra.mxu0 %v4413_v60 }
 0x5df   :  { %3911 = vmatprep.subr.bf16.mxu0 %v4416_v61 }
 0x5e2   :  { %3913 = vmatpush1.bf16.msra.mxu0 %v4425_v7 }
 0x5e3   :  { %3915 = vmatprep.subr.bf16.mxu0 %v4428_v8 }
 0x5e6   :  { %3917 = vmatpush1.bf16.msra.mxu0 %v4435_v16 }
 0x5e7   :  { %3919 = vmatprep.subr.bf16.mxu0 %v4438_v17 }
 0x5ea   :  { %3921 = vmatpush1.bf16.msra.mxu0 %v4445_v26 }
 0x5eb   :  { %3923 = vmatprep.subr.bf16.mxu0 %v4448_v27 }
 0x5ee   :  { %3925 = vmatpush1.bf16.msra.mxu0 %v4455_v37 }
 0x5ef   :  { %3950 = vmatprep.subr.bf16.mxu0 %v4266_v0 }
 0x684   :  { %v1643_v5 = vpop.f32.mrb[16].mxu0  ;;  %v1714_v40 = vpop.f32.mrb[16].mxu1 }
 0x685   :  { %v1644_v47 = vadd.f32 %v1643_v5, %v4615_v32  ;;  %v1715_v54 = vadd.f32 %v1714_v40, %v4535_v44  ;;  %v3147_v14 = vpop.f32.mrb[17].mxu0  ;;  %v1716_v58 = vpop.f32.mrb[17].mxu1 }
 0x686   :  { %v1717_v59 = vadd.f32 %v1716_v58, %v4537_v30 }
 0x687   :  { %1647 = vst [vmem:[#allocation2 + $0x4] sm:$0x1] %v1644_v47  ;;  %v1790_v63 = vrot.slane %v1715_v54, 3 }
 0x688   :  { %v1800_v22 = vrot.slane %v1717_v59, 3 }
 0x689   :  { %v1792_v35 = vadd.f32 %v1790_v63, %v4539_v49 }
 0x68a   :  { %v1802_v36 = vadd.f32 %v1800_v22, %v4542_v55 }
 0x68b   :  { %v2468_v2 = vmul.f32 -1.442695, %v1792_v35 }
 0x68c   :  { %v2469_v6 = vmul.f32 -1.442695, %v1802_v36 }
 0x68d   :  { %4116 = vpow2.f32 %v2468_v2 }
 0x68e   :  { %4118 = vpow2.f32 %v2469_v6 }
 0x697   :  { %v4117_v50 = vpop.eup %4116 }
 0x698   :  { %v4119_v9 = vpop.eup %4118  ;;  %v1796_v15 = vadd.f32 1.0, %v4117_v50 }
 0x699   :  { %v1806_v11 = vadd.f32 1.0, %v4119_v9 }
 0x69b   :  { %4120 = vrcp.f32 %v1806_v11 }
 0x69c   :  { %4122 = vrcp.f32 %v1796_v15 }
 0x6a4   :  { %v1785_v19 = vpop.f32.mrb[18].mxu0 }
 0x6a5   :  { %v4121_v24 = vpop.eup %4120  ;;  %v1786_v25 = vadd.f32 %v1785_v19, %v4547_v20  ;;  %v3182_v39 = vpop.f32.mrb[19].mxu0 }
 0x6a6   :  { %v1819_v5 = vmul.f32 %v4121_v24, %v1817_v28  ;;  %v4123_v47 = vpop.eup %4122  ;;  %v1815_v58 = vsub.f32 1.0, %v4121_v24 }
 0x6a7   :  { %v1810_v40 = vrot.slane %v1786_v25, 3 }
 0x6a9   :  { %v1812_v54 = vmul.f32 %v4123_v47, %v1810_v40 }
 0x6ab   :  { %v1813_v14 = vadd.f32 %v1812_v54, %v4550_v45 }
 0x6ad   :  { %4124 = vtanh.f32 %v1813_v14 }
 0x6b7   :  { %v4125_v59 = vpop.eup %4124 }
 0x6b8   :  { %v1816_v63 = vmul.f32 %v4125_v59, %v1815_v58 }
 0x6ba   :  { %v4881_v22 = vadd.f32 %v1819_v5, %v1816_v63 }
 0x6bc   :  { %v1822_v35 = vrot.slane %v4881_v22, 5  ;;  %v2064_v29 = vrot.slane %v4881_v22, 7 }
 0x6be   :  { %3216 = vmatmul.mubr.f32.vlgmr.msra.gmra.mrb[18].mxu1 %v1822_v35  ;;  %1960 = vmatmul.mubr.f32.vlgmr.msra.gmra.mrb[20].mxu0 %v1822_v35 }
 0x6bf   :  { %3928 = vmatpush3.bf16.msra.mxu1 %v4409_v56  ;;  %3250 = vmatprep.mubr.msk.f32.mxu1 %vm4268_vm0, %v4267_v1 }
 0x6c0   :  { %3929 = vmatprep.subr.bf16.mxu1 %v4266_v0  ;;  %3952 = vmatpush3.bf16.msra.mxu0 %v4497_v48 }
 0x6c1   :  { %3953 = vmatprep.subr.bf16.mxu0 %v4266_v0  ;;  %3285 = vmatprep.mubr.msk.f32.mxu0 %vm4268_vm0, %v4267_v1 }
 0x6c3   :  { %3931 = vmatpush3.bf16.msra.mxu1 %v4419_v3 }
 0x6c4   :  { %3932 = vmatprep.subr.bf16.mxu1 %v4266_v0  ;;  %3955 = vmatpush3.bf16.msra.mxu0 %v4501_v53 }
 0x6c5   :  { %3956 = vmatprep.subr.bf16.mxu0 %v4266_v0 }
 0x6c7   :  { %3934 = vmatpush3.bf16.msra.mxu1 %v4431_v12 }
 0x6c8   :  { %3935 = vmatprep.subr.bf16.mxu1 %v4266_v0  ;;  %3958 = vmatpush3.bf16.msra.mxu0 %v4504_v57 }
 0x6c9   :  { %3959 = vmatprep.subr.bf16.mxu0 %v4266_v0 }
 0x6cb   :  { %3937 = vmatpush3.bf16.msra.mxu1 %v4441_v21 }
 0x6cc   :  { %3938 = vmatprep.subr.bf16.mxu1 %v4266_v0  ;;  %3961 = vmatpush3.bf16.msra.mxu0 %v4509_v62 }
 0x6cd   :  { %3962 = vmatprep.subr.bf16.mxu0 %v4266_v0 }
 0x6cf   :  { %3940 = vmatpush3.bf16.msra.mxu1 %v4451_v31 }
 0x6d0   :  { %3941 = vmatprep.subr.bf16.mxu1 %v4266_v0  ;;  %3964 = vmatpush3.bf16.msra.mxu0 %v4513_v4 }
 0x6d1   :  { %3965 = vmatprep.subr.bf16.mxu0 %v4266_v0 }
 0x6d3   :  { %3943 = vmatpush3.bf16.msra.mxu1 %v4459_v38 }
 0x6d4   :  { %3944 = vmatprep.subr.bf16.mxu1 %v4266_v0  ;;  %3967 = vmatpush3.bf16.msra.mxu0 %v4517_v10 }
 0x6d5   :  { %3968 = vmatprep.subr.bf16.mxu0 %v4266_v0 }
 0x6d7   :  { %3946 = vmatpush3.bf16.msra.mxu1 %v4464_v41 }
 0x6d8   :  { %3947 = vmatprep.subr.bf16.mxu1 %v4266_v0  ;;  %3970 = vmatpush3.bf16.msra.mxu0 %v4520_v13 }
 0x6d9   :  { %3971 = vmatprep.subr.bf16.mxu0 %v4266_v0 }
 0x6db   :  { %3949 = vmatpush3.bf16.msra.mxu1 %v4473_v46 }
 0x6dc   :  { %3975 = vmatprep.subr.bf16.mxu1 %v4377_v23  ;;  %3973 = vmatpush3.bf16.msra.mxu0 %v4524_v18 }
 0x6dd   :  { %4006 = vmatprep.subr.bf16.mxu0 %v4266_v0 }
 0x6de   :  { %3251 = vmatmul.mubr.f32.vlgmr.msra.gmra.mrb[20].mxu1 %v1822_v35 }
 0x6df   :  { %3977 = vmatpush1.bf16.msra.mxu1 %v4389_v33  ;;  %2206 = vmatprep.mubr.f32.mxu1 %v4267_v1 }
 0x6e0   :  { %3979 = vmatprep.subr.bf16.mxu1 %v4392_v34 }
 0x6e3   :  { %3981 = vmatpush1.bf16.msra.mxu1 %v4396_v42 }
 0x6e4   :  { %3983 = vmatprep.subr.bf16.mxu1 %v4400_v43 }
 0x6e7   :  { %3985 = vmatpush1.bf16.msra.mxu1 %v4404_v51 }
 0x6e8   :  { %3987 = vmatprep.subr.bf16.mxu1 %v4407_v52 }
 0x6eb   :  { %3989 = vmatpush1.bf16.msra.mxu1 %v4413_v60 }
 0x6ec   :  { %3991 = vmatprep.subr.bf16.mxu1 %v4416_v61 }
 0x6ef   :  { %3993 = vmatpush1.bf16.msra.mxu1 %v4425_v7 }
 0x6f0   :  { %3995 = vmatprep.subr.bf16.mxu1 %v4428_v8 }
 0x6f3   :  { %3997 = vmatpush1.bf16.msra.mxu1 %v4435_v16 }
 0x6f4   :  { %3999 = vmatprep.subr.bf16.mxu1 %v4438_v17 }
 0x6f7   :  { %4001 = vmatpush1.bf16.msra.mxu1 %v4445_v26 }
 0x6f8   :  { %4003 = vmatprep.subr.bf16.mxu1 %v4448_v27 }
 0x6fb   :  { %4005 = vmatpush1.bf16.msra.mxu1 %v4455_v37 }
 0x6fc   :  { %4030 = vmatprep.subr.bf16.mxu1 %v4266_v0 }
 0x791   :  { %v1890_v23 = vpop.f32.mrb[18].mxu1  ;;  %v1961_v33 = vpop.f32.mrb[20].mxu0 }
 0x792   :  { %v1891_v34 = vadd.f32 %v1890_v23, %v4615_v32  ;;  %v1962_v42 = vadd.f32 %v1961_v33, %v4535_v44  ;;  %v3217_v43 = vpop.f32.mrb[19].mxu1  ;;  %v1963_v51 = vpop.f32.mrb[21].mxu0 }
 0x793   :  { %v1964_v52 = vadd.f32 %v1963_v51, %v4537_v30 }
 0x794   :  { %1894 = vst [vmem:[#allocation2 + $0x5] sm:$0x1] %v1891_v34  ;;  %v2037_v60 = vrot.slane %v1962_v42, 2 }
 0x795   :  { %v2047_v61 = vrot.slane %v1964_v52, 2 }
 0x796   :  { %v2039_v7 = vadd.f32 %v2037_v60, %v4539_v49 }
 0x797   :  { %v2049_v8 = vadd.f32 %v2047_v61, %v4542_v55 }
 0x798   :  { %v2470_v16 = vmul.f32 -1.442695, %v2039_v7 }
 0x799   :  { %v2471_v17 = vmul.f32 -1.442695, %v2049_v8 }
 0x79a   :  { %4126 = vpow2.f32 %v2470_v16 }
 0x79b   :  { %4128 = vpow2.f32 %v2471_v17 }
 0x7a4   :  { %v4127_v26 = vpop.eup %4126 }
 0x7a5   :  { %v4129_v27 = vpop.eup %4128  ;;  %v2043_v32 = vadd.f32 1.0, %v4127_v26 }
 0x7a6   :  { %v2053_v37 = vadd.f32 1.0, %v4129_v27 }
 0x7a8   :  { %4130 = vrcp.f32 %v2053_v37 }
 0x7a9   :  { %4132 = vrcp.f32 %v2043_v32 }
 0x7b1   :  { %v2032_v36 = vpop.f32.mrb[20].mxu1 }
 0x7b2   :  { %v4131_v2 = vpop.eup %4130  ;;  %v2033_v6 = vadd.f32 %v2032_v36, %v4547_v20  ;;  %v3252_v50 = vpop.f32.mrb[21].mxu1 }
 0x7b3   :  { %v2066_v9 = vmul.f32 %v4131_v2, %v2064_v29  ;;  %v4133_v15 = vpop.eup %4132  ;;  %v2062_v24 = vsub.f32 1.0, %v4131_v2 }
 0x7b4   :  { %v2057_v11 = vrot.slane %v2033_v6, 2 }
 0x7b6   :  { %v2059_v28 = vmul.f32 %v4133_v15, %v2057_v11 }
 0x7b8   :  { %v2060_v19 = vadd.f32 %v2059_v28, %v4550_v45 }
 0x7ba   :  { %4134 = vtanh.f32 %v2060_v19 }
 0x7c4   :  { %v4135_v25 = vpop.eup %4134 }
 0x7c5   :  { %v2063_v39 = vmul.f32 %v4135_v25, %v2062_v24 }
 0x7c7   :  { %v4945_v5 = vadd.f32 %v2066_v9, %v2063_v39 }
 0x7c9   :  { %v2069_v40 = vrot.slane %v4945_v5, 6 }
 0x7cb   :  { %3286 = vmatmul.mubr.f32.vlgmr.msra.gmra.mrb[22].mxu0 %v2069_v40  ;;  %2207 = vmatmul.mubr.f32.vlgmr.msra.gmra.mrb[22].mxu1 %v2069_v40 }
 0x7cc   :  { %4008 = vmatpush3.bf16.msra.mxu0 %v4409_v56  ;;  %3320 = vmatprep.mubr.msk.f32.mxu0 %vm4268_vm0, %v4267_v1 }
 0x7cd   :  { %4009 = vmatprep.subr.bf16.mxu0 %v4266_v0  ;;  %4032 = vmatpush3.bf16.msra.mxu1 %v4497_v48 }
 0x7ce   :  { %4033 = vmatprep.subr.bf16.mxu1 %v4266_v0  ;;  %3355 = vmatprep.mubr.msk.f32.mxu1 %vm4268_vm0, %v4267_v1 }
 0x7d0   :  { %4011 = vmatpush3.bf16.msra.mxu0 %v4419_v3  ;;  %v4150_v3 = vld [vmem:[%s5020_s4 + $0x6] sm:$0x1]  ;;  %s4269_s4 = smov [#allocation11]  }
 0x7d1   :  { %4012 = vmatprep.subr.bf16.mxu0 %v4266_v0  ;;  %4035 = vmatpush3.bf16.msra.mxu1 %v4501_v53  ;;  %s2420_s7 = sshll.u32 %s4269_s4, 4  ;;  %s2421_s7 = int_to_ptr.vmem [resolvable:$true] %s2420_s7 }
 0x7d2   :  { %4036 = vmatprep.subr.bf16.mxu1 %v4266_v0  ;;  %s4205_s8 = scalar_lea.vmem %s2421_s7, 16  ;;  %s4209_s9 = scalar_lea.vmem %s2421_s7, 32 }
 0x7d3   :  { %p4206_p5 = scmp.ne.s32.totalorder %s2421_s7, %s4205_s8  ;;  %p4210_p6 = scmp.lt.s32.totalorder %s2421_s7, %s2421_s7 }
 0x7d4   :  { %4014 = vmatpush3.bf16.msra.mxu0 %v4431_v12  ;;  %p4211_p7 = scmp.lt.s32.totalorder %s4209_s9, %s4205_s8 }
 0x7d5   :  { %4015 = vmatprep.subr.bf16.mxu0 %v4266_v0  ;;  %4038 = vmatpush3.bf16.msra.mxu1 %v4504_v57 }
 0x7d6   :  { %4039 = vmatprep.subr.bf16.mxu1 %v4266_v0  ;;  %p4212_p8 = por %p4211_p7, %p4210_p6 }
 0x7d8   :  { %4017 = vmatpush3.bf16.msra.mxu0 %v4441_v21  ;;  %p4213_p9 = pnand %p4212_p8, %p4206_p5 }
 0x7d9   :  { %4018 = vmatprep.subr.bf16.mxu0 %v4266_v0  ;;  %4041 = vmatpush3.bf16.msra.mxu1 %v4509_v62 }
 0x7da   :  { %4042 = vmatprep.subr.bf16.mxu1 %v4266_v0 }
 0x7dc   :  { %4020 = vmatpush3.bf16.msra.mxu0 %v4451_v31 }
 0x7dd   :  { %4021 = vmatprep.subr.bf16.mxu0 %v4266_v0  ;;  %4044 = vmatpush3.bf16.msra.mxu1 %v4513_v4 }
 0x7de   :  { %4045 = vmatprep.subr.bf16.mxu1 %v4266_v0 }
 0x7e0   :  { %4023 = vmatpush3.bf16.msra.mxu0 %v4459_v38 }
 0x7e1   :  { %4024 = vmatprep.subr.bf16.mxu0 %v4266_v0  ;;  %4047 = vmatpush3.bf16.msra.mxu1 %v4517_v10 }
 0x7e2   :  { %4048 = vmatprep.subr.bf16.mxu1 %v4266_v0 }
 0x7e4   :  { %4026 = vmatpush3.bf16.msra.mxu0 %v4464_v41 }
 0x7e5   :  { %4027 = vmatprep.subr.bf16.mxu0 %v4266_v0  ;;  %4050 = vmatpush3.bf16.msra.mxu1 %v4520_v13 }
 0x7e6   :  { %4051 = vmatprep.subr.bf16.mxu1 %v4266_v0 }
 0x7e8   :  { %4029 = vmatpush3.bf16.msra.mxu0 %v4473_v46 }
 0x7e9   :  { %4053 = vmatpush3.bf16.msra.mxu1 %v4524_v18 }
 0x7eb   :  { %3321 = vmatmul.mubr.f32.vlgmr.msra.gmra.mrb[24].mxu0 %v2069_v40 }
 0x89e   :  { %v2137_v1 = vpop.f32.mrb[22].mxu0  ;;  %v2208_v56 = vpop.f32.mrb[22].mxu1 }
 0x89f   :  { %v2138_v12 = vadd.f32 %v4150_v3, %v2137_v1  ;;  %v2209_v21 = vadd.f32 %v2208_v56, %v4535_v44  ;;  %v3287_v31 = vpop.f32.mrb[23].mxu0  ;;  %v2210_v38 = vpop.f32.mrb[23].mxu1  ;;  %v2311_v44 = vrot.slane %v4945_v5, 7 }
 0x8a0   :  { %v2211_v41 = vadd.f32 %v2210_v38, %v4537_v30 }
 0x8a1   :  { %2141 = vst [vmem:[#allocation2 + $0x6] sm:$0x1] %v2138_v12  ;;  %v2284_v0 = vrot.slane %v2209_v21, 1 }
 0x8a2   :  { %v2294_v48 = vrot.slane %v2211_v41, 1 }
 0x8a3   :  { %v2286_v46 = vadd.f32 %v2284_v0, %v4539_v49 }
 0x8a4   :  { %v2296_v53 = vadd.f32 %v2294_v48, %v4542_v55 }
 0x8a5   :  { %v2472_v57 = vmul.f32 -1.442695, %v2286_v46 }
 0x8a6   :  { %v2473_v62 = vmul.f32 -1.442695, %v2296_v53 }
 0x8a7   :  { %4136 = vpow2.f32 %v2472_v57 }
 0x8a8   :  { %4138 = vpow2.f32 %v2473_v62 }
 0x8b1   :  { %v4137_v4 = vpop.eup %4136 }
 0x8b2   :  { %v4139_v10 = vpop.eup %4138  ;;  %v2290_v18 = vadd.f32 1.0, %v4137_v4 }
 0x8b3   :  { %v2300_v13 = vadd.f32 1.0, %v4139_v10 }
 0x8b5   :  { %4140 = vrcp.f32 %v2300_v13 }
 0x8b6   :  { %4142 = vrcp.f32 %v2290_v18 }
 0x8be   :  { %v2279_v30 = vpop.f32.mrb[24].mxu0 }
 0x8bf   :  { %v4141_v47 = vpop.eup %4140  ;;  %v2280_v54 = vadd.f32 %v2279_v30, %v4547_v20  ;;  %v3322_v14 = vpop.f32.mrb[25].mxu0 }
 0x8c0   :  { %v2313_v49 = vmul.f32 %v4141_v47, %v2311_v44  ;;  %v4143_v55 = vpop.eup %4142  ;;  %v2309_v22 = vsub.f32 1.0, %v4141_v47 }
 0x8c1   :  { %v2304_v58 = vrot.slane %v2280_v54, 1 }
 0x8c3   :  { %v2306_v59 = vmul.f32 %v4143_v55, %v2304_v58 }
 0x8c5   :  { %v2307_v63 = vadd.f32 %v2306_v59, %v4550_v45 }
 0x8c7   :  { %4144 = vtanh.f32 %v2307_v63 }
 0x8d1   :  { %v4145_v35 = vpop.eup %4144 }
 0x8d2   :  { %v2310_v23 = vmul.f32 %v4145_v35, %v2309_v22 }
 0x8d4   :  { %v2314_v33 = vadd.f32 %v2313_v49, %v2310_v23 }
 0x8d6   :  { %v2316_v34 = vrot.slane %v2314_v33, 7  ;;  %2390 = vst.msk [vmem:[#allocation11 - $0x7] sm:$0x80] %vm2389_vm9, %v2314_v33 }
 0x8d8   :  { %3356 = vmatmul.mubr.f32.vlgmr.msra.gmra.mrb[24].mxu1 %v2316_v34 }
 0x9ab   :  { %v2384_v42 = vpop.f32.mrb[24].mxu1 }
 0x9ac   :  { %v2385_v43 = vadd.f32 %v4150_v3, %v2384_v42  ;;  %v3357_v51 = vpop.f32.mrb[25].mxu1 }
 0x9ae   :  { %2388 = vst [vmem:[#allocation2 + $0x7] sm:$0x1] %v2385_v43 }
 0x9b5   :  { %v2391_v20 = vld [vmem:[#allocation2] sm:$0xff] }
 0x9b6   :  { %2392 = vmax.xlane.f32.xlu0 %v2391_v20 }
 0xa43   :  { %v2393_v52 = vpop.xlane.xlu0 %2392 }
 0xa44   :  { %v2394_v60 = vsub.f32 %v2391_v20, %v2393_v52 }
 0xa46   :  { %v2395_v61 = vmul.f32 1.442695, %v2394_v60 }
 0xa48   :  { %4146 = vpow2.f32 %v2395_v61 }
 0xa52   :  { %v4147_v45 = vpop.eup %4146 }
 0xa53   :  { %2397 = vadd.xlane.f32.xlu0 %v4147_v45 }
 0xa54   :  { %4216 = shalt.err (!%p4213_p9)
}
 0xa55   :  { %s4217_s11 = scalar_lea.hbm %s5022_s6, 16 }
 0xa56   :  { %p4218_p10 = scmp.ne.s32.totalorder %s5022_s6, %s4217_s11  ;;  %p4221_p11 = scmp.lt.u32.totalorder %s4217_s11, %s5022_s6 }
 0xa58   :  { %p4223_p12 = pnand %p4221_p11, %p4218_p10 }
 0xa5a   :  { %4226 = shalt.err (!%p4223_p12)
}
 0xa5b   :  { %2423 = dma.vmem_to_hbm [thread:$0]  %s2421_s7, 16, %s5022_s6, [#allocation12]   ;;  %vm2402_vm10 = vcmask 523264  }
 0xa5c   :  { %s4270_s17 = smov [#allocation10]  }
 0xa5d   :  { %s2410_s18 = sshll.u32 %s4270_s17, 4  ;;  %s2411_s18 = int_to_ptr.vmem [resolvable:$true] %s2410_s18 }
 0xa5e   :  { %s4227_s19 = scalar_lea.vmem %s2411_s18, 128  ;;  %p4232_p0 = scmp.lt.s32.totalorder %s2411_s18, %s2411_s18 }
 0xa5f   :  { %p4228_p13 = scmp.ne.s32.totalorder %s2411_s18, %s4227_s19  ;;  %p4233_p1 = scmp.lt.s32.totalorder %s4227_s19, %s4227_s19 }
 0xa61   :  { %p4234_p2 = por %p4233_p1, %p4232_p0 }
 0xa63   :  { %p4235_p3 = pnand %p4234_p2, %p4228_p13 }
 0xae0   :  { %v2398_v7 = vpop.xlane.xlu0 %2397 }
 0xae1   :  { %4148 = vlog2.f32 %v2398_v7 }
 0xaeb   :  { %v4149_v8 = vpop.eup %4148 }
 0xaec   :  { %v2400_v16 = vmul.f32 0.6931472, %v4149_v8 }
 0xaee   :  { %v2401_v17 = vsub.f32 %v2394_v60, %v2400_v16 }
 0xaf0   :  { %2403 = vst.msk [vmem:[#allocation10] sm:$0xff] %vm2402_vm10, %v2401_v17 }
 0xaf1   :  { %4238 = shalt.err (!%p4235_p3)
}
 0xaf2   :  { %s4239_s6 = scalar_lea.hbm %s5021_s5, 128 }
 0xaf3   :  { %p4240_p4 = scmp.ne.s32.totalorder %s5021_s5, %s4239_s6  ;;  %p4243_p5 = scmp.lt.u32.totalorder %s4239_s6, %s5021_s5 }
 0xaf5   :  { %p4245_p6 = pnand %p4243_p5, %p4240_p4 }
 0xaf7   :  { %4248 = shalt.err (!%p4245_p6)
}
 0xaf8   :  { %2413 = dma.vmem_to_hbm [thread:$0]  %s2411_s18, 128, %s5021_s5, [#allocation7]  }
 0xaf9   :  { %4255 = dma.done.wait [#allocation7], 128  }
 0xafa   :  { %4256 = vsyncadd [#allocation7], 4294967168 }
 0xafb   :  { %4257 = dma.done.wait [#allocation12], 16  }
 0xafc   :  { %4258 = vsyncadd [#allocation12], 4294967280 }
 0xafd   :  { %2430 = vsyncpa [#allocation6], 1 }
 0xafe   :  { %2431 = vsyncpa [#allocation9], 1 }
 0xaff   :  { %2432 = vsyncpa [#allocation7], 1 }
 0xb00   :  { %2433 = vsyncpa [#allocation12], 1 }

</bundles_post_ra>
